<compile_context>
chip_gen: v5e
topology: v5e:2x2
jax: 0.10.0
libtpu: 0.0.40
codegen_flags: <defaults>
</compile_context>

<pallas_src>
import functools

import numpy as np
import jax
import jax.numpy as jnp
from jax.experimental import pallas as pl
from jax.experimental.pallas import tpu as pltpu

SIGMA = 0.25     # self.sigma
OMEGA = 100.0    # self.omega

_LANE = 128


def _round_up(x, m):
    return ((x + m - 1) // m) * m


def _pad_axis(x, target, axis):
    pad = target - x.shape[axis]
    if pad <= 0:
        return x
    widths = [(0, 0)] * x.ndim
    widths[axis] = (0, pad)
    return jnp.pad(x, widths)


def _pick_tile(s, cap=512):
    """Largest tile (multiple of 8) that divides s and is <= cap, else s."""
    if s <= cap:
        return s
    for t in range(cap, 7, -1):
        if s % t == 0 and t % 8 == 0:
            return t
    return s


# ----------------------------------------------------------------------------
# Kernel 1: fused backbone
#   fl     = relu(patches @ W1 + b1)      (written per spatial tile)
#   gap    = mean_s fl                    (VMEM scratch accumulator)
#   logits = gap @ W2 + b2                (epilogue at the last spatial tile)
# grid = (batch, spatial_tiles); semantics ("parallel", "arbitrary").
# ----------------------------------------------------------------------------
def _backbone_compute(a_ref, w1_ref, b1_ref, w2_ref, b2_ref,
                      logits_ref, gap_ref, inv_s, fl_ref):
    s_idx = pl.program_id(1)

    feat = jnp.maximum(
        jnp.dot(a_ref[0], w1_ref[...], preferred_element_type=jnp.float32)
        + b1_ref[...], 0.0)                                    # (ts, Cf_pad)
    if fl_ref is not None:
        fl_ref[0] = feat

    @pl.when(s_idx == 0)
    def _init():
        gap_ref[...] = jnp.zeros_like(gap_ref)

    gap_ref[...] += jnp.sum(feat, axis=0, keepdims=True) * inv_s

    @pl.when(s_idx == pl.num_programs(1) - 1)
    def _epilogue():
        logits_ref[0] = (jnp.dot(gap_ref[...], w2_ref[...],
                                 preferred_element_type=jnp.float32)
                         + b2_ref[...])


def _backbone_fl_kernel(a_ref, w1_ref, b1_ref, w2_ref, b2_ref,
                        fl_ref, logits_ref, gap_ref, *, inv_s):
    _backbone_compute(a_ref, w1_ref, b1_ref, w2_ref, b2_ref,
                      logits_ref, gap_ref, inv_s, fl_ref)


def _backbone_nofl_kernel(a_ref, w1_ref, b1_ref, w2_ref, b2_ref,
                          logits_ref, gap_ref, *, inv_s):
    _backbone_compute(a_ref, w1_ref, b1_ref, w2_ref, b2_ref,
                      logits_ref, gap_ref, inv_s, None)


def backbone_forward(patches, w1p, b1p, w2p, b2p, *, need_fl):
    n, s, k_pad = patches.shape
    cf_pad = w1p.shape[1]
    nc_pad = w2p.shape[1]
    ts = _pick_tile(s)
    grid = (n, s // ts)

    in_specs = [
        pl.BlockSpec((1, ts, k_pad), lambda i, j: (i, j, 0)),
        pl.BlockSpec((k_pad, cf_pad), lambda i, j: (0, 0)),
        pl.BlockSpec((1, cf_pad), lambda i, j: (0, 0)),
        pl.BlockSpec((cf_pad, nc_pad), lambda i, j: (0, 0)),
        pl.BlockSpec((1, nc_pad), lambda i, j: (0, 0)),
    ]
    logits_spec = pl.BlockSpec((1, 1, nc_pad), lambda i, j: (i, 0, 0))
    scratch = [pltpu.VMEM((1, cf_pad), jnp.float32)]
    cparams = pltpu.CompilerParams(
        dimension_semantics=("parallel", "arbitrary"))

    if need_fl:
        fl, logits3 = pl.pallas_call(
            functools.partial(_backbone_fl_kernel, inv_s=1.0 / s),
            out_shape=(jax.ShapeDtypeStruct((n, s, cf_pad), jnp.float32),
                       jax.ShapeDtypeStruct((n, 1, nc_pad), jnp.float32)),
            grid=grid,
            in_specs=in_specs,
            out_specs=(pl.BlockSpec((1, ts, cf_pad), lambda i, j: (i, j, 0)),
                       logits_spec),
            scratch_shapes=scratch,
            compiler_params=cparams,
        )(patches, w1p, b1p, w2p, b2p)
        return fl, logits3

    logits3 = pl.pallas_call(
        functools.partial(_backbone_nofl_kernel, inv_s=1.0 / s),
        out_shape=jax.ShapeDtypeStruct((n, 1, nc_pad), jnp.float32),
        grid=grid,
        in_specs=in_specs,
        out_specs=logits_spec,
        scratch_shapes=scratch,
        compiler_params=cparams,
    )(patches, w1p, b1p, w2p, b2p)
    return None, logits3


# ----------------------------------------------------------------------------
# Kernel 2: fused backward-hook gradient + GAIN attention map (per sample)
#   g  = (ohe @ W2^T) / S   (exact grad of sum(logits*ohe) wrt fl, already
#                            equal to its spatial average -> the "weights")
#   Ac = relu(fl @ g^T)     MXU contraction over the channel (lane) axis
# ----------------------------------------------------------------------------
def _attention_map_kernel(ohe_ref, w2_ref, fl_ref, ac_ref, *, inv_s):
    g = jax.lax.dot_general(
        ohe_ref[0], w2_ref[...],
        (((1,), (1,)), ((), ())),
        preferred_element_type=jnp.float32) * inv_s            # (1, Cf_pad)
    ac = jax.lax.dot_general(
        fl_ref[0], g,
        (((1,), (1,)), ((), ())),
        preferred_element_type=jnp.float32)                    # (S, 1)
    ac_ref[0] = jnp.maximum(ac, 0.0)


def attention_map(ohe3, w2p, fl):
    n, s, cf_pad = fl.shape
    nc_pad = w2p.shape[1]
    return pl.pallas_call(
        functools.partial(_attention_map_kernel, inv_s=1.0 / s),
        out_shape=jax.ShapeDtypeStruct((n, s, 1), jnp.float32),
        grid=(n,),
        in_specs=[pl.BlockSpec((1, 1, nc_pad), lambda i: (i, 0, 0)),
                  pl.BlockSpec((cf_pad, nc_pad), lambda i: (0, 0)),
                  pl.BlockSpec((1, s, cf_pad), lambda i: (i, 0, 0))],
        out_specs=pl.BlockSpec((1, s, 1), lambda i: (i, 0, 0)),
        compiler_params=pltpu.CompilerParams(
            dimension_semantics=("parallel",)),
    )(ohe3, w2p, fl)


# ----------------------------------------------------------------------------
# Kernel 3: bilinear upsample (align_corners=True) as two plain 2-D matmuls,
#           plus per-sample min/max (for the batch-global normalisation).
# ----------------------------------------------------------------------------
def _upsample_kernel(ac_ref, uh_ref, uwt_ref, heat_ref, min_ref, max_ref):
    t = jnp.dot(uh_ref[...], ac_ref[0], preferred_element_type=jnp.float32)
    up = jnp.dot(t, uwt_ref[...], preferred_element_type=jnp.float32)
    heat_ref[0, 0] = up
    min_ref[0] = jnp.min(up, keepdims=True)
    max_ref[0] = jnp.max(up, keepdims=True)


def upsample_minmax(ac2d, uh, uwt):
    n, hf, wf = ac2d.shape
    h = uh.shape[0]
    w = uwt.shape[1]
    return pl.pallas_call(
        _upsample_kernel,
        out_shape=(jax.ShapeDtypeStruct((n, 1, h, w), jnp.float32),
                   jax.ShapeDtypeStruct((n, 1, 1), jnp.float32),
                   jax.ShapeDtypeStruct((n, 1, 1), jnp.float32)),
        grid=(n,),
        in_specs=[pl.BlockSpec((1, hf, wf), lambda i: (i, 0, 0)),
                  pl.BlockSpec((h, hf), lambda i: (0, 0)),
                  pl.BlockSpec((wf, w), lambda i: (0, 0))],
        out_specs=(pl.BlockSpec((1, 1, h, w), lambda i: (i, 0, 0, 0)),
                   pl.BlockSpec((1, 1, 1), lambda i: (i, 0, 0)),
                   pl.BlockSpec((1, 1, 1), lambda i: (i, 0, 0))),
        compiler_params=pltpu.CompilerParams(
            dimension_semantics=("parallel",)),
    )(ac2d, uh, uwt)


# ----------------------------------------------------------------------------
# Kernel 4: soft mask + masked image (per sample); batch-global min/max fed in
#           as (1,1) VMEM scalars, zero-range guarded (PyTorch would NaN).
# ----------------------------------------------------------------------------
def _mask_apply_kernel(min_ref, max_ref, heat_ref, img_ref, masked_ref):
    amin = min_ref[...]                                    # (1, 1)
    rng = max_ref[...] - amin                              # (1, 1)
    inv = jnp.where(rng > 0.0, 1.0, 0.0) / jnp.where(rng > 0.0, rng, 1.0)
    up = heat_ref[0, 0]                                    # (H, W)
    scaled = (up - amin) * inv
    mask = jax.nn.sigmoid(OMEGA * (scaled - SIGMA))        # (H, W)
    img = img_ref[0]                                       # (Cin, H, W)
    masked_ref[0] = img - img * mask[None, :, :]


def mask_apply(amin2, amax2, heatmap, images):
    n, cin, h, w = images.shape
    return pl.pallas_call(
        _mask_apply_kernel,
        out_shape=jax.ShapeDtypeStruct((n, cin, h, w), jnp.float32),
        grid=(n,),
        in_specs=[pl.BlockSpec((1, 1), lambda i: (0, 0)),
                  pl.BlockSpec((1, 1), lambda i: (0, 0)),
                  pl.BlockSpec((1, 1, h, w), lambda i: (i, 0, 0, 0)),
                  pl.BlockSpec((1, cin, h, w), lambda i: (i, 0, 0, 0))],
        out_specs=pl.BlockSpec((1, cin, h, w), lambda i: (i, 0, 0, 0)),
        compiler_params=pltpu.CompilerParams(
            dimension_semantics=("parallel",)),
    )(amin2, amax2, heatmap, images)


# ----------------------------------------------------------------------------
# Plain-JAX glue
# ----------------------------------------------------------------------------
def patchify(images, p):
    """im2col for a non-overlapping p x p patch conv; output (N, S, Cin*p*p)."""
    n, c, h, w = images.shape
    hf, wf = h // p, w // p
    x = images.reshape(n, c, hf, p, wf, p)
    x = jnp.transpose(x, (0, 2, 4, 1, 3, 5))      # (n, hf, wf, c, p, p)
    return x.reshape(n, hf * wf, c * p * p), hf, wf


def bilinear_matrix(out_size, in_size):
    """Row-interpolation matrix for F.upsample_bilinear (align_corners=True)."""
    m = np.zeros((out_size, in_size), dtype=np.float32)
    if in_size == 1 or out_size == 1:
        m[:, 0] = 1.0
        return m
    scale = (in_size - 1) / (out_size - 1)
    for i in range(out_size):
        src = i * scale
        j0 = min(int(np.floor(src)), in_size - 2)
        t = src - j0
        m[i, j0] = 1.0 - t
        m[i, j0 + 1] = t
    return m


def init_params(key, cin, patch, cfeat, num_classes):
    k1, k2, k3, k4 = jax.random.split(key, 4)
    return dict(
        w1=0.1 * jax.random.normal(k1, (cin * patch * patch, cfeat), jnp.float32),
        b1=0.1 * jax.random.normal(k2, (cfeat,), jnp.float32),
        w2=0.1 * jax.random.normal(k3, (cfeat, num_classes), jnp.float32),
        b2=0.1 * jax.random.normal(k4, (num_classes,), jnp.float32),
    )


def gain_forward(params, images, labels, num_classes, patch):
    """Equivalent of GAIN_classification.forward (training branch)."""
    n, cin, h, w = images.shape
    k, cf = params["w1"].shape
    k_pad = _round_up(k, _LANE)
    cf_pad = _round_up(cf, _LANE)
    nc_pad = _round_up(num_classes, _LANE)

    # Lane-dense zero-padded parameters; padding is exact (contributes 0).
    # NOTE: on v6e/v7x, casting patches/W1/W2 to bfloat16 (keeping f32
    # accumulation) roughly doubles MXU throughput; kept f32 here for exact
    # parity with the PyTorch module and for v5e's f32-only VPU/EUP.
    w1p = _pad_axis(_pad_axis(params["w1"], k_pad, 0), cf_pad, 1)
    b1p = _pad_axis(params["b1"], cf_pad, 0).reshape(1, cf_pad)
    w2p = _pad_axis(_pad_axis(params["w2"], cf_pad, 0), nc_pad, 1)
    b2p = _pad_axis(params["b2"], nc_pad, 0).reshape(1, nc_pad)

    # ---- first model pass (forward hook == fl output) ----
    patches, hf, wf = patchify(images, patch)
    patches = _pad_axis(patches, k_pad, 2)
    s = hf * wf

    fl, logits3 = backbone_forward(patches, w1p, b1p, w2p, b2p, need_fl=True)
    logits = logits3[:, 0, :num_classes]

    # TODO(synk): eval branch (softmax-argmax pseudo labels) and the
    # model.train()/eval()/zero_grad() hook bookkeeping have no kernel
    # equivalent; the training branch (labels -> one-hot) is implemented.
    ohe3 = jax.nn.one_hot(labels, nc_pad, dtype=jnp.float32).reshape(n, 1, nc_pad)

    # fused backward-hook gradient + attention map (no (N,Cf,S) round trip)
    ac = attention_map(ohe3, w2p, fl)                  # (N, S, 1)
    ac2d = ac.reshape(n, hf, wf)                       # contiguous -> free

    uh = jnp.asarray(bilinear_matrix(h, hf))           # (H, hf)
    uwt = jnp.asarray(bilinear_matrix(w, wf).T)        # (wf, W), pre-transposed
    heatmap, mins, maxs = upsample_minmax(ac2d, uh, uwt)

    # batch-global min/max, as in the PyTorch module (Ac.min() / Ac.max()).
    amin2 = jnp.min(mins).reshape(1, 1)
    amax2 = jnp.max(maxs).reshape(1, 1)

    masked_image = mask_apply(amin2, amax2, heatmap, images)

    # ---- second model pass on the masked image (fl output not needed) ----
    patches2, _, _ = patchify(masked_image, patch)
    patches2 = _pad_axis(patches2, k_pad, 2)
    _, logits3_am = backbone_forward(patches2, w1p, b1p, w2p, b2p,
                                     need_fl=False)
    logits_am = logits3_am[:, 0, :num_classes]

    return logits, logits_am, heatmap


if __name__ == "__main__":
    N, CIN, H, W = 2, 3, 16, 16
    PATCH, CFEAT, NUM_CLASSES = 4, 8, 5

    key = jax.random.PRNGKey(0)
    kimg, klab, kpar = jax.random.split(key, 3)
    images = jax.random.normal(kimg, (N, CIN, H, W), jnp.float32)
    labels = jax.random.randint(klab, (N,), 0, NUM_CLASSES)
    params = init_params(kpar, CIN, PATCH, CFEAT, NUM_CLASSES)

    gain_fn = jax.jit(functools.partial(gain_forward,
                                        num_classes=NUM_CLASSES, patch=PATCH))
    logits, logits_am, heatmap = gain_fn(params, images, labels)
    jax.block_until_ready((logits, logits_am, heatmap))

    assert logits.shape == (N, NUM_CLASSES)
    assert logits_am.shape == (N, NUM_CLASSES)
    assert heatmap.shape == (N, 1, H, W)
    print("KERNEL_OK")
</pallas_src>

<mosaic_0001>
module attributes {stable_mosaic.version = 11 : i64} {
  func.func @_backbone_fl_kernel(%arg0: i32, %arg1: i32, %arg2: memref<1x16x128xf32, #tpu.memory_space<vmem>>, %arg3: memref<128x128xf32, #tpu.memory_space<vmem>>, %arg4: memref<1x128xf32, #tpu.memory_space<vmem>>, %arg5: memref<128x128xf32, #tpu.memory_space<vmem>>, %arg6: memref<1x128xf32, #tpu.memory_space<vmem>>, %arg7: memref<1x16x128xf32, #tpu.memory_space<vmem>>, %arg8: memref<1x1x128xf32, #tpu.memory_space<vmem>>, %arg9: memref<1x128xf32, #tpu.memory_space<vmem>>) attributes {dimension_semantics = [#tpu.dimension_semantics<parallel>, #tpu.dimension_semantics<arbitrary>], iteration_bounds = array<i64: 2, 1>, scalar_prefetch = 0 : i64, scratch_operands = 1 : i64, tpu.core_type = #tpu.core_type<tc>, window_params = [{transform_indices = @transform_0, window_bounds = array<i64: 1, 16, 128>}, {pipeline_mode = #tpu.pipeline_mode<synchronous>, transform_indices = @transform_1, window_bounds = array<i64: 128, 128>}, {pipeline_mode = #tpu.pipeline_mode<synchronous>, transform_indices = @transform_2, window_bounds = array<i64: 1, 128>}, {pipeline_mode = #tpu.pipeline_mode<synchronous>, transform_indices = @transform_3, window_bounds = array<i64: 128, 128>}, {pipeline_mode = #tpu.pipeline_mode<synchronous>, transform_indices = @transform_4, window_bounds = array<i64: 1, 128>}, {transform_indices = @transform_5, window_bounds = array<i64: 1, 16, 128>}, {transform_indices = @transform_6, window_bounds = array<i64: 1, 1, 128>}]} {
    %c0 = arith.constant 0 : index
    %c0_0 = arith.constant 0 : index
    %c0_1 = arith.constant 0 : index
    %0 = vector.load %arg2[%c0, %c0_0, %c0_1] : memref<1x16x128xf32, #tpu.memory_space<vmem>>, vector<1x16x128xf32>
    %1 = vector.shape_cast %0 : vector<1x16x128xf32> to vector<16x128xf32>
    %c0_2 = arith.constant 0 : index
    %c0_3 = arith.constant 0 : index
    %2 = vector.load %arg3[%c0_2, %c0_3] : memref<128x128xf32, #tpu.memory_space<vmem>>, vector<128x128xf32>
    %cst = arith.constant dense<0.000000e+00> : vector<16x128xf32>
    %3 = tpu.matmul %1, %2, %cst {dimension_numbers = #tpu.dot_dimension_numbers<[1], [0], [0], [1], [0, 0, 1, 1], [], []>} : vector<16x128xf32>, vector<128x128xf32>, vector<16x128xf32> -> vector<16x128xf32>
    %c0_4 = arith.constant 0 : index
    %c0_5 = arith.constant 0 : index
    %4 = vector.load %arg4[%c0_4, %c0_5] : memref<1x128xf32, #tpu.memory_space<vmem>>, vector<1x128xf32>
    %5 = vector.broadcast %4 : vector<1x128xf32> to vector<16x128xf32>
    %6 = arith.addf %3, %5 : vector<16x128xf32>
    %cst_6 = arith.constant 0.000000e+00 : f32
    %7 = vector.broadcast %cst_6 : f32 to vector<16x128xf32>
    %8 = arith.maximumf %6, %7 : vector<16x128xf32>
    %c0_7 = arith.constant 0 : index
    %c0_8 = arith.constant 0 : index
    %c0_9 = arith.constant 0 : index
    %9 = vector.load %arg7[%c0_7, %c0_8, %c0_9] : memref<1x16x128xf32, #tpu.memory_space<vmem>>, vector<1x16x128xf32>
    %10 = vector.shape_cast %9 : vector<1x16x128xf32> to vector<16x128xf32>
    %11 = vector.shape_cast %8 : vector<16x128xf32> to vector<1x16x128xf32>
    tpu.vector_store %arg7[%c0_7, %c0_8, %c0_9], %11 {strides = array<i32>} : memref<1x16x128xf32, #tpu.memory_space<vmem>>, vector<1x16x128xf32>,
    %c0_i32 = arith.constant 0 : i32
    %12 = arith.cmpi eq, %arg1, %c0_i32 : i32
    %13 = arith.extui %12 : i1 to i32
    %c0_i32_10 = arith.constant 0 : i32
    %14 = arith.cmpi ne, %13, %c0_i32_10 : i32
    scf.if %14 {
      %cst_19 = arith.constant 0.000000e+00 : f32
      %25 = vector.broadcast %cst_19 : f32 to vector<1x128xf32>
      %c0_20 = arith.constant 0 : index
      %c0_21 = arith.constant 0 : index
      %26 = vector.load %arg9[%c0_20, %c0_21] : memref<1x128xf32, #tpu.memory_space<vmem>>, vector<1x128xf32>
      tpu.vector_store %arg9[%c0_20, %c0_21], %25 {strides = array<i32>} : memref<1x128xf32, #tpu.memory_space<vmem>>, vector<1x128xf32>,
    } else {
    }
    %c0_11 = arith.constant 0 : index
    %c0_12 = arith.constant 0 : index
    %15 = vector.load %arg9[%c0_11, %c0_12] : memref<1x128xf32, #tpu.memory_space<vmem>>, vector<1x128xf32>
    %cst_13 = arith.constant dense<0.000000e+00> : vector<128xf32>
    %16 = vector.multi_reduction <add>, %8, %cst_13 [0] : vector<16x128xf32> to vector<128xf32>
    %17 = vector.shape_cast %16 : vector<128xf32> to vector<1x128xf32>
    %cst_14 = arith.constant 6.250000e-02 : f32
    %18 = vector.broadcast %cst_14 : f32 to vector<1x128xf32>
    %19 = arith.mulf %17, %18 : vector<1x128xf32>
    %20 = arith.addf %15, %19 : vector<1x128xf32>
    %c0_15 = arith.constant 0 : index
    %c0_16 = arith.constant 0 : index
    %21 = vector.load %arg9[%c0_15, %c0_16] : memref<1x128xf32, #tpu.memory_space<vmem>>, vector<1x128xf32>
    tpu.vector_store %arg9[%c0_15, %c0_16], %20 {strides = array<i32>} : memref<1x128xf32, #tpu.memory_space<vmem>>, vector<1x128xf32>,
    %c0_i32_17 = arith.constant 0 : i32
    %22 = arith.cmpi eq, %arg1, %c0_i32_17 : i32
    %23 = arith.extui %22 : i1 to i32
    %c0_i32_18 = arith.constant 0 : i32
    %24 = arith.cmpi ne, %23, %c0_i32_18 : i32
    scf.if %24 {
      %c0_19 = arith.constant 0 : index
      %c0_20 = arith.constant 0 : index
      %25 = vector.load %arg9[%c0_19, %c0_20] : memref<1x128xf32, #tpu.memory_space<vmem>>, vector<1x128xf32>
      %c0_21 = arith.constant 0 : index
      %c0_22 = arith.constant 0 : index
      %26 = vector.load %arg5[%c0_21, %c0_22] : memref<128x128xf32, #tpu.memory_space<vmem>>, vector<128x128xf32>
      %cst_23 = arith.constant dense<0.000000e+00> : vector<1x128xf32>
      %27 = tpu.matmul %25, %26, %cst_23 {dimension_numbers = #tpu.dot_dimension_numbers<[1], [0], [0], [1], [0, 0, 1, 1], [], []>} : vector<1x128xf32>, vector<128x128xf32>, vector<1x128xf32> -> vector<1x128xf32>
      %c0_24 = arith.constant 0 : index
      %c0_25 = arith.constant 0 : index
      %28 = vector.load %arg6[%c0_24, %c0_25] : memref<1x128xf32, #tpu.memory_space<vmem>>, vector<1x128xf32>
      %29 = arith.addf %27, %28 : vector<1x128xf32>
      %c0_26 = arith.constant 0 : index
      %c0_27 = arith.constant 0 : index
      %c0_28 = arith.constant 0 : index
      %30 = vector.load %arg8[%c0_26, %c0_27, %c0_28] : memref<1x1x128xf32, #tpu.memory_space<vmem>>, vector<1x1x128xf32>
      %31 = vector.shape_cast %30 : vector<1x1x128xf32> to vector<1x128xf32>
      %32 = vector.shape_cast %29 : vector<1x128xf32> to vector<1x1x128xf32>
      tpu.vector_store %arg8[%c0_26, %c0_27, %c0_28], %32 {strides = array<i32>} : memref<1x1x128xf32, #tpu.memory_space<vmem>>, vector<1x1x128xf32>,
    } else {
    }
    return
  }
  func.func @transform_0(%arg0: i32, %arg1: i32) -> (i32, i32, i32) {
    %c0_i32 = arith.constant 0 : i32
    %c0_i32_0 = arith.constant 0 : i32
    return %arg0, %arg1, %c0_i32 : i32, i32, i32
  }
  func.func @transform_1(%arg0: i32, %arg1: i32) -> (i32, i32) {
    %c0_i32 = arith.constant 0 : i32
    %c0_i32_0 = arith.constant 0 : i32
    %c0_i32_1 = arith.constant 0 : i32
    return %c0_i32, %c0_i32_0 : i32, i32
  }
  func.func @transform_2(%arg0: i32, %arg1: i32) -> (i32, i32) {
    %c0_i32 = arith.constant 0 : i32
    %c0_i32_0 = arith.constant 0 : i32
    %c0_i32_1 = arith.constant 0 : i32
    return %c0_i32, %c0_i32_0 : i32, i32
  }
  func.func @transform_3(%arg0: i32, %arg1: i32) -> (i32, i32) {
    %c0_i32 = arith.constant 0 : i32
    %c0_i32_0 = arith.constant 0 : i32
    %c0_i32_1 = arith.constant 0 : i32
    return %c0_i32, %c0_i32_0 : i32, i32
  }
  func.func @transform_4(%arg0: i32, %arg1: i32) -> (i32, i32) {
    %c0_i32 = arith.constant 0 : i32
    %c0_i32_0 = arith.constant 0 : i32
    %c0_i32_1 = arith.constant 0 : i32
    return %c0_i32, %c0_i32_0 : i32, i32
  }
  func.func @transform_5(%arg0: i32, %arg1: i32) -> (i32, i32, i32) {
    %c0_i32 = arith.constant 0 : i32
    %c0_i32_0 = arith.constant 0 : i32
    return %arg0, %arg1, %c0_i32 : i32, i32, i32
  }
  func.func @transform_6(%arg0: i32, %arg1: i32) -> (i32, i32, i32) {
    %c0_i32 = arith.constant 0 : i32
    %c0_i32_0 = arith.constant 0 : i32
    %c0_i32_1 = arith.constant 0 : i32
    return %arg0, %c0_i32, %c0_i32_0 : i32, i32, i32
  }
}

module attributes {stable_mosaic.version = 11 : i64} {
  func.func @_attention_map_kernel(%arg0: i32, %arg1: memref<1x1x128xf32, #tpu.memory_space<vmem>>, %arg2: memref<128x128xf32, #tpu.memory_space<vmem>>, %arg3: memref<1x16x128xf32, #tpu.memory_space<vmem>>, %arg4: memref<1x16x1xf32, #tpu.memory_space<vmem>>) attributes {dimension_semantics = [#tpu.dimension_semantics<parallel>], iteration_bounds = array<i64: 2>, scalar_prefetch = 0 : i64, scratch_operands = 0 : i64, tpu.core_type = #tpu.core_type<tc>, window_params = [{transform_indices = @transform_0, window_bounds = array<i64: 1, 1, 128>}, {pipeline_mode = #tpu.pipeline_mode<synchronous>, transform_indices = @transform_1, window_bounds = array<i64: 128, 128>}, {transform_indices = @transform_2, window_bounds = array<i64: 1, 16, 128>}, {transform_indices = @transform_3, window_bounds = array<i64: 1, 16, 1>}]} {
    %c0 = arith.constant 0 : index
    %c0_0 = arith.constant 0 : index
    %c0_1 = arith.constant 0 : index
    %0 = vector.load %arg1[%c0, %c0_0, %c0_1] : memref<1x1x128xf32, #tpu.memory_space<vmem>>, vector<1x1x128xf32>
    %1 = vector.shape_cast %0 : vector<1x1x128xf32> to vector<1x128xf32>
    %c0_2 = arith.constant 0 : index
    %c0_3 = arith.constant 0 : index
    %2 = vector.load %arg2[%c0_2, %c0_3] : memref<128x128xf32, #tpu.memory_space<vmem>>, vector<128x128xf32>
    %cst = arith.constant dense<0.000000e+00> : vector<1x128xf32>
    %3 = tpu.matmul %1, %2, %cst {dimension_numbers = #tpu.dot_dimension_numbers<[1], [1], [0], [0], [0, 0, 1, 0], [], []>} : vector<1x128xf32>, vector<128x128xf32>, vector<1x128xf32> -> vector<1x128xf32>
    %cst_4 = arith.constant 6.250000e-02 : f32
    %4 = vector.broadcast %cst_4 : f32 to vector<1x128xf32>
    %5 = arith.mulf %3, %4 : vector<1x128xf32>
    %c0_5 = arith.constant 0 : index
    %c0_6 = arith.constant 0 : index
    %c0_7 = arith.constant 0 : index
    %6 = vector.load %arg3[%c0_5, %c0_6, %c0_7] : memref<1x16x128xf32, #tpu.memory_space<vmem>>, vector<1x16x128xf32>
    %7 = vector.shape_cast %6 : vector<1x16x128xf32> to vector<16x128xf32>
    %cst_8 = arith.constant dense<0.000000e+00> : vector<16x1xf32>
    %8 = tpu.matmul %7, %5, %cst_8 {dimension_numbers = #tpu.dot_dimension_numbers<[1], [1], [0], [0], [0, 0, 1, 0], [], []>} : vector<16x128xf32>, vector<1x128xf32>, vector<16x1xf32> -> vector<16x1xf32>
    %cst_9 = arith.constant 0.000000e+00 : f32
    %9 = vector.broadcast %cst_9 : f32 to vector<16x1xf32>
    %10 = arith.maximumf %8, %9 : vector<16x1xf32>
    %c0_10 = arith.constant 0 : index
    %c0_11 = arith.constant 0 : index
    %c0_12 = arith.constant 0 : index
    %11 = vector.load %arg4[%c0_10, %c0_11, %c0_12] : memref<1x16x1xf32, #tpu.memory_space<vmem>>, vector<1x16x1xf32>
    %12 = vector.shape_cast %11 : vector<1x16x1xf32> to vector<16x1xf32>
    %13 = vector.shape_cast %10 : vector<16x1xf32> to vector<1x16x1xf32>
    tpu.vector_store %arg4[%c0_10, %c0_11, %c0_12], %13 {strides = array<i32>} : memref<1x16x1xf32, #tpu.memory_space<vmem>>, vector<1x16x1xf32>,
    return
  }
  func.func @transform_0(%arg0: i32) -> (i32, i32, i32) {
    %c0_i32 = arith.constant 0 : i32
    %c0_i32_0 = arith.constant 0 : i32
    %c0_i32_1 = arith.constant 0 : i32
    return %arg0, %c0_i32, %c0_i32_0 : i32, i32, i32
  }
  func.func @transform_1(%arg0: i32) -> (i32, i32) {
    %c0_i32 = arith.constant 0 : i32
    %c0_i32_0 = arith.constant 0 : i32
    %c0_i32_1 = arith.constant 0 : i32
    return %c0_i32, %c0_i32_0 : i32, i32
  }
  func.func @transform_2(%arg0: i32) -> (i32, i32, i32) {
    %c0_i32 = arith.constant 0 : i32
    %c0_i32_0 = arith.constant 0 : i32
    %c0_i32_1 = arith.constant 0 : i32
    return %arg0, %c0_i32, %c0_i32_0 : i32, i32, i32
  }
  func.func @transform_3(%arg0: i32) -> (i32, i32, i32) {
    %c0_i32 = arith.constant 0 : i32
    %c0_i32_0 = arith.constant 0 : i32
    %c0_i32_1 = arith.constant 0 : i32
    return %arg0, %c0_i32, %c0_i32_0 : i32, i32, i32
  }
}

module attributes {stable_mosaic.version = 11 : i64} {
  func.func @_upsample_kernel(%arg0: i32, %arg1: memref<1x4x4xf32, #tpu.memory_space<vmem>>, %arg2: memref<16x4xf32, #tpu.memory_space<vmem>>, %arg3: memref<4x16xf32, #tpu.memory_space<vmem>>, %arg4: memref<1x1x16x16xf32, #tpu.memory_space<vmem>>, %arg5: memref<1x1x1xf32, #tpu.memory_space<vmem>>, %arg6: memref<1x1x1xf32, #tpu.memory_space<vmem>>) attributes {dimension_semantics = [#tpu.dimension_semantics<parallel>], iteration_bounds = array<i64: 2>, scalar_prefetch = 0 : i64, scratch_operands = 0 : i64, tpu.core_type = #tpu.core_type<tc>, window_params = [{transform_indices = @transform_0, window_bounds = array<i64: 1, 4, 4>}, {pipeline_mode = #tpu.pipeline_mode<synchronous>, transform_indices = @transform_1, window_bounds = array<i64: 16, 4>}, {pipeline_mode = #tpu.pipeline_mode<synchronous>, transform_indices = @transform_2, window_bounds = array<i64: 4, 16>}, {transform_indices = @transform_3, window_bounds = array<i64: 1, 1, 16, 16>}, {transform_indices = @transform_4, window_bounds = array<i64: 1, 1, 1>}, {transform_indices = @transform_5, window_bounds = array<i64: 1, 1, 1>}]} {
    %c0 = arith.constant 0 : index
    %c0_0 = arith.constant 0 : index
    %0 = vector.load %arg2[%c0, %c0_0] : memref<16x4xf32, #tpu.memory_space<vmem>>, vector<16x4xf32>
    %c0_1 = arith.constant 0 : index
    %c0_2 = arith.constant 0 : index
    %c0_3 = arith.constant 0 : index
    %1 = vector.load %arg1[%c0_1, %c0_2, %c0_3] : memref<1x4x4xf32, #tpu.memory_space<vmem>>, vector<1x4x4xf32>
    %2 = vector.shape_cast %1 : vector<1x4x4xf32> to vector<4x4xf32>
    %cst = arith.constant dense<0.000000e+00> : vector<16x4xf32>
    %3 = tpu.matmul %0, %2, %cst {dimension_numbers = #tpu.dot_dimension_numbers<[1], [0], [0], [1], [0, 0, 1, 1], [], []>} : vector<16x4xf32>, vector<4x4xf32>, vector<16x4xf32> -> vector<16x4xf32>
    %c0_4 = arith.constant 0 : index
    %c0_5 = arith.constant 0 : index
    %4 = vector.load %arg3[%c0_4, %c0_5] : memref<4x16xf32, #tpu.memory_space<vmem>>, vector<4x16xf32>
    %cst_6 = arith.constant dense<0.000000e+00> : vector<16x16xf32>
    %5 = tpu.matmul %3, %4, %cst_6 {dimension_numbers = #tpu.dot_dimension_numbers<[1], [0], [0], [1], [0, 0, 1, 1], [], []>} : vector<16x4xf32>, vector<4x16xf32>, vector<16x16xf32> -> vector<16x16xf32>
    %c0_7 = arith.constant 0 : index
    %c0_8 = arith.constant 0 : index
    %c0_9 = arith.constant 0 : index
    %c0_10 = arith.constant 0 : index
    %6 = vector.load %arg4[%c0_7, %c0_8, %c0_9, %c0_10] : memref<1x1x16x16xf32, #tpu.memory_space<vmem>>, vector<1x1x16x16xf32>
    %7 = vector.shape_cast %6 : vector<1x1x16x16xf32> to vector<16x16xf32>
    %8 = vector.shape_cast %5 : vector<16x16xf32> to vector<1x1x16x16xf32>
    tpu.vector_store %arg4[%c0_7, %c0_8, %c0_9, %c0_10], %8 {strides = array<i32>} : memref<1x1x16x16xf32, #tpu.memory_space<vmem>>, vector<1x1x16x16xf32>,
    %9 = vector.shape_cast %5 : vector<16x16xf32> to vector<1x16x16xf32>
    %cst_11 = arith.constant dense<0x7F800000> : vector<1xf32>
    %10 = vector.multi_reduction <minimumf>, %9, %cst_11 [1, 2] : vector<1x16x16xf32> to vector<1xf32>
    %11 = vector.shape_cast %10 : vector<1xf32> to vector<1x1x1xf32>
    %12 = vector.extract %11[0, 0, 0] : f32 from vector<1x1x1xf32>
    %13 = vector.broadcast %12 : f32 to vector<1x1xf32>
    %c0_12 = arith.constant 0 : index
    %c0_13 = arith.constant 0 : index
    %c0_14 = arith.constant 0 : index
    %14 = vector.load %arg5[%c0_12, %c0_13, %c0_14] : memref<1x1x1xf32, #tpu.memory_space<vmem>>, vector<1x1x1xf32>
    %15 = vector.shape_cast %14 : vector<1x1x1xf32> to vector<1x1xf32>
    %16 = vector.shape_cast %13 : vector<1x1xf32> to vector<1x1x1xf32>
    tpu.vector_store %arg5[%c0_12, %c0_13, %c0_14], %16 {strides = array<i32>} : memref<1x1x1xf32, #tpu.memory_space<vmem>>, vector<1x1x1xf32>,
    %17 = vector.shape_cast %5 : vector<16x16xf32> to vector<1x16x16xf32>
    %cst_15 = arith.constant dense<0xFF800000> : vector<1xf32>
    %18 = vector.multi_reduction <maximumf>, %17, %cst_15 [1, 2] : vector<1x16x16xf32> to vector<1xf32>
    %19 = vector.shape_cast %18 : vector<1xf32> to vector<1x1x1xf32>
    %20 = vector.extract %19[0, 0, 0] : f32 from vector<1x1x1xf32>
    %21 = vector.broadcast %20 : f32 to vector<1x1xf32>
    %c0_16 = arith.constant 0 : index
    %c0_17 = arith.constant 0 : index
    %c0_18 = arith.constant 0 : index
    %22 = vector.load %arg6[%c0_16, %c0_17, %c0_18] : memref<1x1x1xf32, #tpu.memory_space<vmem>>, vector<1x1x1xf32>
    %23 = vector.shape_cast %22 : vector<1x1x1xf32> to vector<1x1xf32>
    %24 = vector.shape_cast %21 : vector<1x1xf32> to vector<1x1x1xf32>
    tpu.vector_store %arg6[%c0_16, %c0_17, %c0_18], %24 {strides = array<i32>} : memref<1x1x1xf32, #tpu.memory_space<vmem>>, vector<1x1x1xf32>,
    return
  }
  func.func @transform_0(%arg0: i32) -> (i32, i32, i32) {
    %c0_i32 = arith.constant 0 : i32
    %c0_i32_0 = arith.constant 0 : i32
    %c0_i32_1 = arith.constant 0 : i32
    return %arg0, %c0_i32, %c0_i32_0 : i32, i32, i32
  }
  func.func @transform_1(%arg0: i32) -> (i32, i32) {
    %c0_i32 = arith.constant 0 : i32
    %c0_i32_0 = arith.constant 0 : i32
    %c0_i32_1 = arith.constant 0 : i32
    return %c0_i32, %c0_i32_0 : i32, i32
  }
  func.func @transform_2(%arg0: i32) -> (i32, i32) {
    %c0_i32 = arith.constant 0 : i32
    %c0_i32_0 = arith.constant 0 : i32
    %c0_i32_1 = arith.constant 0 : i32
    return %c0_i32, %c0_i32_0 : i32, i32
  }
  func.func @transform_3(%arg0: i32) -> (i32, i32, i32, i32) {
    %c0_i32 = arith.constant 0 : i32
    %c0_i32_0 = arith.constant 0 : i32
    %c0_i32_1 = arith.constant 0 : i32
    %c0_i32_2 = arith.constant 0 : i32
    return %arg0, %c0_i32, %c0_i32_0, %c0_i32_1 : i32, i32, i32, i32
  }
  func.func @transform_4(%arg0: i32) -> (i32, i32, i32) {
    %c0_i32 = arith.constant 0 : i32
    %c0_i32_0 = arith.constant 0 : i32
    %c0_i32_1 = arith.constant 0 : i32
    return %arg0, %c0_i32, %c0_i32_0 : i32, i32, i32
  }
  func.func @transform_5(%arg0: i32) -> (i32, i32, i32) {
    %c0_i32 = arith.constant 0 : i32
    %c0_i32_0 = arith.constant 0 : i32
    %c0_i32_1 = arith.constant 0 : i32
    return %arg0, %c0_i32, %c0_i32_0 : i32, i32, i32
  }
}

module attributes {stable_mosaic.version = 11 : i64} {
  func.func @_mask_apply_kernel(%arg0: i32, %arg1: memref<1x1xf32, #tpu.memory_space<vmem>>, %arg2: memref<1x1xf32, #tpu.memory_space<vmem>>, %arg3: memref<1x1x16x16xf32, #tpu.memory_space<vmem>>, %arg4: memref<1x3x16x16xf32, #tpu.memory_space<vmem>>, %arg5: memref<1x3x16x16xf32, #tpu.memory_space<vmem>>) attributes {dimension_semantics = [#tpu.dimension_semantics<parallel>], iteration_bounds = array<i64: 2>, scalar_prefetch = 0 : i64, scratch_operands = 0 : i64, tpu.core_type = #tpu.core_type<tc>, window_params = [{pipeline_mode = #tpu.pipeline_mode<synchronous>, transform_indices = @transform_0, window_bounds = array<i64: 1, 1>}, {pipeline_mode = #tpu.pipeline_mode<synchronous>, transform_indices = @transform_1, window_bounds = array<i64: 1, 1>}, {transform_indices = @transform_2, window_bounds = array<i64: 1, 1, 16, 16>}, {transform_indices = @transform_3, window_bounds = array<i64: 1, 3, 16, 16>}, {transform_indices = @transform_4, window_bounds = array<i64: 1, 3, 16, 16>}]} {
    %c0 = arith.constant 0 : index
    %c0_0 = arith.constant 0 : index
    %0 = vector.load %arg1[%c0, %c0_0] : memref<1x1xf32, #tpu.memory_space<vmem>>, vector<1x1xf32>
    %c0_1 = arith.constant 0 : index
    %c0_2 = arith.constant 0 : index
    %1 = vector.load %arg2[%c0_1, %c0_2] : memref<1x1xf32, #tpu.memory_space<vmem>>, vector<1x1xf32>
    %2 = arith.subf %1, %0 : vector<1x1xf32>
    %cst = arith.constant 0.000000e+00 : f32
    %3 = vector.broadcast %cst : f32 to vector<1x1xf32>
    %4 = arith.cmpf ogt, %2, %3 : vector<1x1xf32>
    %cst_3 = arith.constant 1.000000e+00 : f32
    %cst_4 = arith.constant 0.000000e+00 : f32
    %5 = vector.broadcast %cst_3 : f32 to vector<1x1xf32>
    %6 = vector.broadcast %cst_4 : f32 to vector<1x1xf32>
    %7 = arith.select %4, %5, %6 : vector<1x1xi1>, vector<1x1xf32>
    %cst_5 = arith.constant 0.000000e+00 : f32
    %8 = vector.broadcast %cst_5 : f32 to vector<1x1xf32>
    %9 = arith.cmpf ogt, %2, %8 : vector<1x1xf32>
    %cst_6 = arith.constant 1.000000e+00 : f32
    %10 = vector.broadcast %cst_6 : f32 to vector<1x1xf32>
    %11 = arith.select %9, %2, %10 : vector<1x1xi1>, vector<1x1xf32>
    %12 = arith.divf %7, %11 : vector<1x1xf32>
    %c0_7 = arith.constant 0 : index
    %c0_8 = arith.constant 0 : index
    %c0_9 = arith.constant 0 : index
    %c0_10 = arith.constant 0 : index
    %13 = vector.load %arg3[%c0_7, %c0_8, %c0_9, %c0_10] : memref<1x1x16x16xf32, #tpu.memory_space<vmem>>, vector<1x1x16x16xf32>
    %14 = vector.shape_cast %13 : vector<1x1x16x16xf32> to vector<16x16xf32>
    %15 = vector.broadcast %0 : vector<1x1xf32> to vector<16x16xf32>
    %16 = arith.subf %14, %15 : vector<16x16xf32>
    %17 = vector.broadcast %12 : vector<1x1xf32> to vector<16x16xf32>
    %18 = arith.mulf %16, %17 : vector<16x16xf32>
    %cst_11 = arith.constant 2.500000e-01 : f32
    %19 = vector.broadcast %cst_11 : f32 to vector<16x16xf32>
    %20 = arith.subf %18, %19 : vector<16x16xf32>
    %cst_12 = arith.constant 1.000000e+02 : f32
    %21 = vector.broadcast %cst_12 : f32 to vector<16x16xf32>
    %22 = arith.mulf %21, %20 : vector<16x16xf32>
    %23 = arith.negf %22 : vector<16x16xf32>
    %24 = math.exp %23 : vector<16x16xf32>
    %cst_13 = arith.constant 1.000000e+00 : f32
    %25 = vector.broadcast %cst_13 : f32 to vector<16x16xf32>
    %26 = arith.addf %25, %24 : vector<16x16xf32>
    %27 = arith.divf %25, %26 : vector<16x16xf32>
    %c0_14 = arith.constant 0 : index
    %c0_15 = arith.constant 0 : index
    %c0_16 = arith.constant 0 : index
    %c0_17 = arith.constant 0 : index
    %28 = vector.load %arg4[%c0_14, %c0_15, %c0_16, %c0_17] : memref<1x3x16x16xf32, #tpu.memory_space<vmem>>, vector<1x3x16x16xf32>
    %29 = vector.shape_cast %28 : vector<1x3x16x16xf32> to vector<3x16x16xf32>
    %30 = vector.shape_cast %27 : vector<16x16xf32> to vector<1x16x16xf32>
    %31 = vector.broadcast %30 : vector<1x16x16xf32> to vector<3x16x16xf32>
    %32 = arith.mulf %29, %31 : vector<3x16x16xf32>
    %33 = arith.subf %29, %32 : vector<3x16x16xf32>
    %c0_18 = arith.constant 0 : index
    %c0_19 = arith.constant 0 : index
    %c0_20 = arith.constant 0 : index
    %c0_21 = arith.constant 0 : index
    %34 = vector.load %arg5[%c0_18, %c0_19, %c0_20, %c0_21] : memref<1x3x16x16xf32, #tpu.memory_space<vmem>>, vector<1x3x16x16xf32>
    %35 = vector.shape_cast %34 : vector<1x3x16x16xf32> to vector<3x16x16xf32>
    %36 = vector.shape_cast %33 : vector<3x16x16xf32> to vector<1x3x16x16xf32>
    tpu.vector_store %arg5[%c0_18, %c0_19, %c0_20, %c0_21], %36 {strides = array<i32>} : memref<1x3x16x16xf32, #tpu.memory_space<vmem>>, vector<1x3x16x16xf32>,
    return
  }
  func.func @transform_0(%arg0: i32) -> (i32, i32) {
    %c0_i32 = arith.constant 0 : i32
    %c0_i32_0 = arith.constant 0 : i32
    %c0_i32_1 = arith.constant 0 : i32
    return %c0_i32, %c0_i32_0 : i32, i32
  }
  func.func @transform_1(%arg0: i32) -> (i32, i32) {
    %c0_i32 = arith.constant 0 : i32
    %c0_i32_0 = arith.constant 0 : i32
    %c0_i32_1 = arith.constant 0 : i32
    return %c0_i32, %c0_i32_0 : i32, i32
  }
  func.func @transform_2(%arg0: i32) -> (i32, i32, i32, i32) {
    %c0_i32 = arith.constant 0 : i32
    %c0_i32_0 = arith.constant 0 : i32
    %c0_i32_1 = arith.constant 0 : i32
    %c0_i32_2 = arith.constant 0 : i32
    return %arg0, %c0_i32, %c0_i32_0, %c0_i32_1 : i32, i32, i32, i32
  }
  func.func @transform_3(%arg0: i32) -> (i32, i32, i32, i32) {
    %c0_i32 = arith.constant 0 : i32
    %c0_i32_0 = arith.constant 0 : i32
    %c0_i32_1 = arith.constant 0 : i32
    %c0_i32_2 = arith.constant 0 : i32
    return %arg0, %c0_i32, %c0_i32_0, %c0_i32_1 : i32, i32, i32, i32
  }
  func.func @transform_4(%arg0: i32) -> (i32, i32, i32, i32) {
    %c0_i32 = arith.constant 0 : i32
    %c0_i32_0 = arith.constant 0 : i32
    %c0_i32_1 = arith.constant 0 : i32
    %c0_i32_2 = arith.constant 0 : i32
    return %arg0, %c0_i32, %c0_i32_0, %c0_i32_1 : i32, i32, i32, i32
  }
}

module attributes {stable_mosaic.version = 11 : i64} {
  func.func @_backbone_nofl_kernel(%arg0: i32, %arg1: i32, %arg2: memref<1x16x128xf32, #tpu.memory_space<vmem>>, %arg3: memref<128x128xf32, #tpu.memory_space<vmem>>, %arg4: memref<1x128xf32, #tpu.memory_space<vmem>>, %arg5: memref<128x128xf32, #tpu.memory_space<vmem>>, %arg6: memref<1x128xf32, #tpu.memory_space<vmem>>, %arg7: memref<1x1x128xf32, #tpu.memory_space<vmem>>, %arg8: memref<1x128xf32, #tpu.memory_space<vmem>>) attributes {dimension_semantics = [#tpu.dimension_semantics<parallel>, #tpu.dimension_semantics<arbitrary>], iteration_bounds = array<i64: 2, 1>, scalar_prefetch = 0 : i64, scratch_operands = 1 : i64, tpu.core_type = #tpu.core_type<tc>, window_params = [{transform_indices = @transform_0, window_bounds = array<i64: 1, 16, 128>}, {pipeline_mode = #tpu.pipeline_mode<synchronous>, transform_indices = @transform_1, window_bounds = array<i64: 128, 128>}, {pipeline_mode = #tpu.pipeline_mode<synchronous>, transform_indices = @transform_2, window_bounds = array<i64: 1, 128>}, {pipeline_mode = #tpu.pipeline_mode<synchronous>, transform_indices = @transform_3, window_bounds = array<i64: 128, 128>}, {pipeline_mode = #tpu.pipeline_mode<synchronous>, transform_indices = @transform_4, window_bounds = array<i64: 1, 128>}, {transform_indices = @transform_5, window_bounds = array<i64: 1, 1, 128>}]} {
    %c0 = arith.constant 0 : index
    %c0_0 = arith.constant 0 : index
    %c0_1 = arith.constant 0 : index
    %0 = vector.load %arg2[%c0, %c0_0, %c0_1] : memref<1x16x128xf32, #tpu.memory_space<vmem>>, vector<1x16x128xf32>
    %1 = vector.shape_cast %0 : vector<1x16x128xf32> to vector<16x128xf32>
    %c0_2 = arith.constant 0 : index
    %c0_3 = arith.constant 0 : index
    %2 = vector.load %arg3[%c0_2, %c0_3] : memref<128x128xf32, #tpu.memory_space<vmem>>, vector<128x128xf32>
    %cst = arith.constant dense<0.000000e+00> : vector<16x128xf32>
    %3 = tpu.matmul %1, %2, %cst {dimension_numbers = #tpu.dot_dimension_numbers<[1], [0], [0], [1], [0, 0, 1, 1], [], []>} : vector<16x128xf32>, vector<128x128xf32>, vector<16x128xf32> -> vector<16x128xf32>
    %c0_4 = arith.constant 0 : index
    %c0_5 = arith.constant 0 : index
    %4 = vector.load %arg4[%c0_4, %c0_5] : memref<1x128xf32, #tpu.memory_space<vmem>>, vector<1x128xf32>
    %5 = vector.broadcast %4 : vector<1x128xf32> to vector<16x128xf32>
    %6 = arith.addf %3, %5 : vector<16x128xf32>
    %cst_6 = arith.constant 0.000000e+00 : f32
    %7 = vector.broadcast %cst_6 : f32 to vector<16x128xf32>
    %8 = arith.maximumf %6, %7 : vector<16x128xf32>
    %c0_i32 = arith.constant 0 : i32
    %9 = arith.cmpi eq, %arg1, %c0_i32 : i32
    %10 = arith.extui %9 : i1 to i32
    %c0_i32_7 = arith.constant 0 : i32
    %11 = arith.cmpi ne, %10, %c0_i32_7 : i32
    scf.if %11 {
      %cst_16 = arith.constant 0.000000e+00 : f32
      %22 = vector.broadcast %cst_16 : f32 to vector<1x128xf32>
      %c0_17 = arith.constant 0 : index
      %c0_18 = arith.constant 0 : index
      %23 = vector.load %arg8[%c0_17, %c0_18] : memref<1x128xf32, #tpu.memory_space<vmem>>, vector<1x128xf32>
      tpu.vector_store %arg8[%c0_17, %c0_18], %22 {strides = array<i32>} : memref<1x128xf32, #tpu.memory_space<vmem>>, vector<1x128xf32>,
    } else {
    }
    %c0_8 = arith.constant 0 : index
    %c0_9 = arith.constant 0 : index
    %12 = vector.load %arg8[%c0_8, %c0_9] : memref<1x128xf32, #tpu.memory_space<vmem>>, vector<1x128xf32>
    %cst_10 = arith.constant dense<0.000000e+00> : vector<128xf32>
    %13 = vector.multi_reduction <add>, %8, %cst_10 [0] : vector<16x128xf32> to vector<128xf32>
    %14 = vector.shape_cast %13 : vector<128xf32> to vector<1x128xf32>
    %cst_11 = arith.constant 6.250000e-02 : f32
    %15 = vector.broadcast %cst_11 : f32 to vector<1x128xf32>
    %16 = arith.mulf %14, %15 : vector<1x128xf32>
    %17 = arith.addf %12, %16 : vector<1x128xf32>
    %c0_12 = arith.constant 0 : index
    %c0_13 = arith.constant 0 : index
    %18 = vector.load %arg8[%c0_12, %c0_13] : memref<1x128xf32, #tpu.memory_space<vmem>>, vector<1x128xf32>
    tpu.vector_store %arg8[%c0_12, %c0_13], %17 {strides = array<i32>} : memref<1x128xf32, #tpu.memory_space<vmem>>, vector<1x128xf32>,
    %c0_i32_14 = arith.constant 0 : i32
    %19 = arith.cmpi eq, %arg1, %c0_i32_14 : i32
    %20 = arith.extui %19 : i1 to i32
    %c0_i32_15 = arith.constant 0 : i32
    %21 = arith.cmpi ne, %20, %c0_i32_15 : i32
    scf.if %21 {
      %c0_16 = arith.constant 0 : index
      %c0_17 = arith.constant 0 : index
      %22 = vector.load %arg8[%c0_16, %c0_17] : memref<1x128xf32, #tpu.memory_space<vmem>>, vector<1x128xf32>
      %c0_18 = arith.constant 0 : index
      %c0_19 = arith.constant 0 : index
      %23 = vector.load %arg5[%c0_18, %c0_19] : memref<128x128xf32, #tpu.memory_space<vmem>>, vector<128x128xf32>
      %cst_20 = arith.constant dense<0.000000e+00> : vector<1x128xf32>
      %24 = tpu.matmul %22, %23, %cst_20 {dimension_numbers = #tpu.dot_dimension_numbers<[1], [0], [0], [1], [0, 0, 1, 1], [], []>} : vector<1x128xf32>, vector<128x128xf32>, vector<1x128xf32> -> vector<1x128xf32>
      %c0_21 = arith.constant 0 : index
      %c0_22 = arith.constant 0 : index
      %25 = vector.load %arg6[%c0_21, %c0_22] : memref<1x128xf32, #tpu.memory_space<vmem>>, vector<1x128xf32>
      %26 = arith.addf %24, %25 : vector<1x128xf32>
      %c0_23 = arith.constant 0 : index
      %c0_24 = arith.constant 0 : index
      %c0_25 = arith.constant 0 : index
      %27 = vector.load %arg7[%c0_23, %c0_24, %c0_25] : memref<1x1x128xf32, #tpu.memory_space<vmem>>, vector<1x1x128xf32>
      %28 = vector.shape_cast %27 : vector<1x1x128xf32> to vector<1x128xf32>
      %29 = vector.shape_cast %26 : vector<1x128xf32> to vector<1x1x128xf32>
      tpu.vector_store %arg7[%c0_23, %c0_24, %c0_25], %29 {strides = array<i32>} : memref<1x1x128xf32, #tpu.memory_space<vmem>>, vector<1x1x128xf32>,
    } else {
    }
    return
  }
  func.func @transform_0(%arg0: i32, %arg1: i32) -> (i32, i32, i32) {
    %c0_i32 = arith.constant 0 : i32
    %c0_i32_0 = arith.constant 0 : i32
    return %arg0, %arg1, %c0_i32 : i32, i32, i32
  }
  func.func @transform_1(%arg0: i32, %arg1: i32) -> (i32, i32) {
    %c0_i32 = arith.constant 0 : i32
    %c0_i32_0 = arith.constant 0 : i32
    %c0_i32_1 = arith.constant 0 : i32
    return %c0_i32, %c0_i32_0 : i32, i32
  }
  func.func @transform_2(%arg0: i32, %arg1: i32) -> (i32, i32) {
    %c0_i32 = arith.constant 0 : i32
    %c0_i32_0 = arith.constant 0 : i32
    %c0_i32_1 = arith.constant 0 : i32
    return %c0_i32, %c0_i32_0 : i32, i32
  }
  func.func @transform_3(%arg0: i32, %arg1: i32) -> (i32, i32) {
    %c0_i32 = arith.constant 0 : i32
    %c0_i32_0 = arith.constant 0 : i32
    %c0_i32_1 = arith.constant 0 : i32
    return %c0_i32, %c0_i32_0 : i32, i32
  }
  func.func @transform_4(%arg0: i32, %arg1: i32) -> (i32, i32) {
    %c0_i32 = arith.constant 0 : i32
    %c0_i32_0 = arith.constant 0 : i32
    %c0_i32_1 = arith.constant 0 : i32
    return %c0_i32, %c0_i32_0 : i32, i32
  }
  func.func @transform_5(%arg0: i32, %arg1: i32) -> (i32, i32, i32) {
    %c0_i32 = arith.constant 0 : i32
    %c0_i32_0 = arith.constant 0 : i32
    %c0_i32_1 = arith.constant 0 : i32
    return %arg0, %c0_i32, %c0_i32_0 : i32, i32, i32
  }
}

</mosaic_0001>

<bundles_post_ra>
// kernel: gain_forward.7
= control target key start
LH: loop header
LB: loop body
LE: loop exit
PB: predicated region body
PF: predicated region fallthrough
CT: control target
= control target key end

     0   :  { %s515_s18 = smov 0   ;;  %s553_s0 = inlined_call_operand.vmem [shape: f32[2,4,4], index: 0, kind: input, shape index: {}]   ;;  %s554_s1 = inlined_call_operand.vmem [shape: f32[16,4], index: 1, kind: input, shape index: {}]   ;;  %s555_s2 = inlined_call_operand.vmem [shape: f32[4,16], index: 2, kind: input, shape index: {}]   ;;  %s556_s3 = inlined_call_operand.vmem [shape: f32[2,1,16,16], index: 3, kind: output, shape index: {0}]   ;;  %s557_s4 = inlined_call_operand.vmem [shape: f32[2,1,1], index: 4, kind: output, shape index: {1}]   ;;  %s558_s5 = inlined_call_operand.vmem [shape: f32[2,1,1], index: 5, kind: output, shape index: {2}]  }
   0x1 LB: > { %s446_s19 = sadd.s32 4294967295, %s483_s18   ;;  %p450_p0 = scmp.ge.s32.totalorder %s483_s18, 1  ;;  %s483_s18 = sphi %s515_s18, %s16_s18  }
   0x2   : > { %p191_p1 = scmp.lt.s32.totalorder %s483_s18, 3 }
   0x4   : > { %p192_p2 = pnand %p450_p0, %p191_p1 }
   0x5   : > { %p224_p3 = scmp.lt.s32.totalorder (!%p192_p2), %s446_s19, 1 }
   0x6   : > { %195 = sbr.rel (%p192_p2) target bundleno = 471 (0x1d7), region = 32 }
   0xb   : > { %s560_s19 = smov (!%p224_p3, %s446_s19), 1  ;;  %vm249_vm0 = vcmask 1043456   ;;  %v240_v0 = vld [vmem:[%s554_s1 + $0x8] sm:$0xff]  ;;  %vm242_vm1 = vcmask 31744   ;;  %v239_v1 = vld [vmem:[%s554_s1] sm:$0xff]  ;;  %vm309_vm2 = vcmask 130048  }
   0xc   : > { %s451_s20 = sshll.u32 %s560_s19, 2  ;;  %v276_v3 = vld [vmem:[%s555_s2] sm:$0xf]  ;;  %s462_s30 = sshll.u32 %s560_s19, 4  ;;  %vm325_vm3 = vcmask 0  }
   0xd   : > { %s227_s23 = scalar_lea.vmem %s553_s0, %s451_s20  ;;  %464 = vmatpush.msk.msra.mxu3 %vm249_vm0, %v276_v3  ;;  %457 = vmatpush.msk.msra.mxu1 %vm249_vm0, %v276_v3  ;;  %s232_s8 = scalar_lea.vmem %s556_s3, %s462_s30 }
   0xe   : > { %v241_v2 = vld [vmem:[%s227_s23] sm:$0xf]  ;;  %s235_s11 = scalar_lea.vmem %s557_s4, %s560_s19  ;;  %s238_s15 = scalar_lea.vmem %s558_s5, %s560_s19 }
   0xf   : > { %463 = vmatpush.msk.msra.mxu2 %vm249_vm0, %v241_v2  ;;  %454 = vmatpush.msk.msra.mxu0 %vm249_vm0, %v241_v2 }
  0x10   : > { %456 = vmatmul.msk.f32.vlgmr.msra.gmra.mxu2 %vm242_vm1, %v240_v0  ;;  %455 = vmatmul.msk.f32.vlgmr.msra.gmra.mxu0 %vm242_vm1, %v239_v1 }
  0x8d   : > { %v270_v4 = vpop.f32.mrf.mxu0 }
  0x8e   : > { %458 = vmatmul.msk.f32.vlgmr.msra.gmra.mxu1 %vm242_vm1, %v270_v4 }
  0x93   : > { %v273_v5 = vpop.f32.mrf.mxu2 }
  0x94   : > { %459 = vmatmul.msk.f32.vlgmr.msra.gmra.mxu3 %vm242_vm1, %v273_v5 }
 0x10b   : > { %v303_v6 = vpop.f32.mrf.mxu1 }
 0x10c   : > { %310 = vst.msk [vmem:[%s232_s8] sm:$0xff] %vm309_vm2, %v303_v6  ;;  %v312_v7 = vsel %vm309_vm2, %v303_v6, inf  ;;  %v327_v11 = vsel %vm309_vm2, %v303_v6, -inf }
 0x117   : > { %v306_v8 = vpop.f32.mrf.mxu3 }
 0x118   : > { %311 = vst.msk [vmem:[%s232_s8 + $0x8] sm:$0xff] %vm309_vm2, %v306_v8  ;;  %v313_v9 = vsel %vm309_vm2, %v306_v8, inf  ;;  %v328_v12 = vsel %vm309_vm2, %v306_v8, -inf }
 0x119   : > { %v314_v10 = vmin.f32 %v312_v7, %v313_v9  ;;  %v329_v13 = vmax.f32 %v327_v11, %v328_v12 }
 0x11b   : > { %315 = vmin.xlane.f32.xlu0 %v314_v10 }
 0x123   : > { %330 = vmax.xlane.f32.xlu0 %v329_v13 }
 0x18e   : > { %v316_v14 = vpop.xlane.xlu0 %315 }
 0x18f   : > { %v317_v15 = vrot.slane %v316_v14, 4 }
 0x191   : > { %v318_v16 = vmin.f32 %v316_v14, %v317_v15 }
 0x193   : > { %v319_v17 = vrot.slane %v318_v16, 2 }
 0x195   : > { %v320_v18 = vmin.f32 %v318_v16, %v319_v17 }
 0x196   : > { %v331_v19 = vpop.xlane.xlu0 %330 }
 0x197   : > { %v332_v20 = vrot.slane %v331_v19, 4  ;;  %v321_v21 = vrot.slane %v320_v18, 1 }
 0x199   : > { %v333_v22 = vmax.f32 %v331_v19, %v332_v20  ;;  %v322_v23 = vmin.f32 %v320_v18, %v321_v21 }
 0x19b   : > { %v334_v24 = vrot.slane %v333_v22, 2  ;;  %465 = vpush %v322_v23 }
 0x19d   : > { %v335_v25 = vmax.f32 %v333_v22, %v334_v24 }
 0x19f   : > { %v336_v26 = vrot.slane %v335_v25, 1 }
 0x1a1   : > { %v337_v27 = vmax.f32 %v335_v25, %v336_v26 }
 0x1a3   : > { %467 = vpush %v337_v27 }
 0x1cc   : > { %s466_s12 = spop %465 }
 0x1cd   : > { %v324_v28 = vstv %s466_s12 }
 0x1ce   : > { %326 = vst.msk [vmem:[%s235_s11] sm:$0x1] %vm325_vm3, %v324_v28 }
 0x1d4   : > { %s468_s16 = spop %467 }
 0x1d5   : > { %v339_v29 = vstv %s468_s16 }
 0x1d6   : > { %340 = vst.msk [vmem:[%s238_s15] sm:$0x1] %vm325_vm3, %v339_v29 }
 0x1d7 PF: > { %s16_s18 = sadd.s32 1, %s483_s18  }
 0x1d8   : > { %p13_p4 = scmp.ge.s32.totalorder %s16_s18, 4  }
 0x1da   :  { %15 = sbr.rel (!%p13_p4) target bundleno = 1 (0x1), region = 86 }

// kernel: gain_forward.8
= control target key start
LH: loop header
LB: loop body
LE: loop exit
PB: predicated region body
PF: predicated region fallthrough
CT: control target
= control target key end

     0   :  { %s475_s19 = smov 0   ;;  %s510_s0 = inlined_call_operand.<no memory space> [shape: f32[1,1], index: 0, kind: input, shape index: {}]   ;;  %s511_s2 = inlined_call_operand.vmem [shape: f32[2,1,16,16], index: 2, kind: input, shape index: {}]   ;;  %s512_s3 = inlined_call_operand.vmem [shape: f32[2,3,16,16], index: 3, kind: input, shape index: {}]   ;;  %s513_s4 = inlined_call_operand.vmem [shape: f32[2,3,16,16], index: 4, kind: output, shape index: {}]   ;;  %s514_s1 = inlined_call_operand.<no memory space> [shape: f32[1,1], index: 1, kind: input, shape index: {}]  }
   0x1   :  { %v9_v0 = vstv %s510_s0  ;;  %v11_v1 = vstv %s514_s1 }
   0x2   :  { %10 = vst [vmem:[#allocation2] sm:$0x1] %v9_v0 }
   0x3   :  { %12 = vst [vmem:[#allocation3] sm:$0x1] %v11_v1 }
   0x4 LB: > { %s395_s20 = sadd.s32 4294967295, %s440_s19   ;;  %p399_p0 = scmp.ge.s32.totalorder %s440_s19, 1  ;;  %s440_s19 = sphi %s475_s19, %s18_s19  }
   0x5   : > { %p176_p1 = scmp.lt.s32.totalorder %s440_s19, 3 }
   0x7   : > { %p177_p2 = pnand %p399_p0, %p176_p1 }
   0x8   : > { %p207_p3 = scmp.lt.s32.totalorder (!%p177_p2), %s395_s20, 1 }
   0x9   : > { %180 = sbr.rel (%p177_p2) target bundleno = 199 (0xc7), region = 36 }
   0xe   : > { %v222_v2 = vld [vmem:[#allocation2] sm:$0x1]  ;;  %v223_v3 = vld [vmem:[#allocation3] sm:$0x1]  ;;  %v442_v4 = vmov 0   ;;  %v443_v16 = vmov 0.0  }
   0xf   : > { %422 = vset.pattern.permute.xlu0 %v442_v4  ;;  %v423_v5 = vld [vmem:[#allocation2] ss:$0 sm:$0xff]  ;;  %v224_v6 = vsub.f32 %v223_v3, %v222_v2  ;;  %s516_s20 = smov (!%p207_p3, %s395_s20), 1  ;;  %vm321_vm13 = vcmask 130048  }
  0x10   : > { %248 = vperm.xlu0 %422, %v423_v5   ;;  %s410_s0 = sshll.u32 %s516_s20, 4  ;;  %s411_s23 = smul.u32 48, %s516_s20 }
  0x11   : > { %vm225_vm0 = vcmp.gt.f32.partialorder %v224_v6, 0.0  ;;  %s211_s22 = scalar_lea.vmem %s511_s2, %s410_s0 }
  0x12   : > { %v227_v7 = vsel %vm225_vm0, %v224_v6, 1.0  ;;  %v226_v17 = vsel %vm225_vm0, 1.0, %v443_v16  ;;  %v243_v23 = vld [vmem:[%s211_s22] sm:$0xff]  ;;  %v244_v24 = vld [vmem:[%s211_s22 + $0x8] sm:$0xff]  ;;  %s216_s26 = scalar_lea.vmem %s512_s3, %s411_s23  ;;  %s221_s29 = scalar_lea.vmem %s513_s4, %s411_s23 }
  0x13   : > { %424 = vrcp.f32 %v227_v7  ;;  %v239_v10 = vand.u32 2147483648, %v227_v7  ;;  %vm233_vm1 = vweird.f32 %v227_v7  ;;  %v237_v12 = vand.u32 2147483647, %v227_v7  ;;  %v303_v52 = vld [vmem:[%s216_s26] sm:$0xff]  ;;  %v304_v53 = vld [vmem:[%s216_s26 + $0x8] sm:$0xff]  ;;  %v305_v55 = vld [vmem:[%s216_s26 + $0x10] sm:$0xff] }
  0x14   : > { %v307_v56 = vld [vmem:[%s216_s26 + $0x20] sm:$0xff]  ;;  %v306_v59 = vld [vmem:[%s216_s26 + $0x18] sm:$0xff]  ;;  %v308_v60 = vld [vmem:[%s216_s26 + $0x28] sm:$0xff] }
  0x15   : > { %v240_v14 = vor.u32 1.1754944e-38, %v239_v10  ;;  %vm238_vm4 = vcmp.eq.f32.partialorder %v237_v12, 8.507059e+37 }
  0x19   : > { %v425_v8 = vpop.eup %424 }
  0x1a   : > { %v229_v9 = vmul.f32 %v425_v8, %v227_v7  ;;  %vm234_vm2 = vweird.f32 %v425_v8 }
  0x1b   : > { %vm235_vm3 = vmor %vm233_vm1, %vm234_vm2 }
  0x1c   : > { %v230_v11 = vsub.f32 1.0, %v229_v9 }
  0x1e   : > { %v231_v13 = vmul.f32 %v425_v8, %v230_v11 }
  0x20   : > { %v232_v15 = vadd.f32 %v425_v8, %v231_v13 }
  0x22   : > { %v236_v18 = vsel %vm235_vm3, %v425_v8, %v232_v15 }
  0x23   : > { %v241_v19 = vsel %vm238_vm4, %v240_v14, %v236_v18 }
  0x24   : > { %v242_v20 = vmul.f32 %v241_v19, %v226_v17 }
  0x26   : > { %v254_v21 = vperm.slane %v242_v20, 0 }
  0x28   : > { %256 = vperm.xlu0 %422, %v254_v21  }
  0x82   : > { %v249_v22 = vpop.permute.xlu0 %248 }
  0x83   : > { %v251_v25 = vsub.f32 %v243_v23, %v249_v22  ;;  %v252_v26 = vsub.f32 %v244_v24, %v249_v22 }
  0x9a   : > { %v257_v27 = vpop.permute.xlu0 %256 }
  0x9b   : > { %v259_v28 = vmul.f32 %v257_v27, %v251_v25  ;;  %v260_v29 = vmul.f32 %v257_v27, %v252_v26 }
  0x9d   : > { %v404_v30 = vadd.f32 -0.25, %v259_v28  ;;  %v405_v31 = vadd.f32 -0.25, %v260_v29 }
  0x9f   : > { %v406_v32 = vmul.f32 -100.0, %v404_v30  ;;  %v407_v33 = vmul.f32 -100.0, %v405_v31 }
  0xa1   : > { %v267_v34 = vmul.f32 1.442695, %v406_v32  ;;  %v269_v35 = vmul.f32 1.442695, %v407_v33 }
  0xa3   : > { %426 = vpow2.f32 %v267_v34 }
  0xa4   : > { %428 = vpow2.f32 %v269_v35 }
  0xa9   : > { %v427_v36 = vpop.eup %426 }
  0xaa   : > { %v429_v37 = vpop.eup %428  ;;  %v271_v38 = vadd.f32 1.0, %v427_v36 }
  0xab   : > { %v272_v39 = vadd.f32 1.0, %v429_v37 }
  0xac   : > { %430 = vrcp.f32 %v271_v38  ;;  %v284_v45 = vand.u32 2147483648, %v271_v38  ;;  %v282_v48 = vand.u32 2147483647, %v271_v38  ;;  %vm278_vm7 = vweird.f32 %v271_v38 }
  0xad   : > { %432 = vrcp.f32 %v272_v39  ;;  %v299_v49 = vand.u32 2147483648, %v272_v39  ;;  %v297_v51 = vand.u32 2147483647, %v272_v39  ;;  %vm293_vm9 = vweird.f32 %v272_v39 }
  0xae   : > { %v285_v57 = vor.u32 1.1754944e-38, %v284_v45  ;;  %vm283_vm10 = vcmp.eq.f32.partialorder %v282_v48, 8.507059e+37 }
  0xaf   : > { %v300_v62 = vor.u32 1.1754944e-38, %v299_v49  ;;  %vm298_vm12 = vcmp.eq.f32.partialorder %v297_v51, 8.507059e+37 }
  0xb2   : > { %v431_v40 = vpop.eup %430 }
  0xb3   : > { %v433_v41 = vpop.eup %432  ;;  %v274_v42 = vmul.f32 %v431_v40, %v271_v38  ;;  %vm279_vm5 = vweird.f32 %v431_v40 }
  0xb4   : > { %v289_v43 = vmul.f32 %v433_v41, %v272_v39  ;;  %vm294_vm6 = vweird.f32 %v433_v41  ;;  %vm280_vm8 = vmor %vm278_vm7, %vm279_vm5 }
  0xb5   : > { %v275_v44 = vsub.f32 1.0, %v274_v42  ;;  %vm295_vm11 = vmor %vm293_vm9, %vm294_vm6 }
  0xb6   : > { %v290_v46 = vsub.f32 1.0, %v289_v43 }
  0xb7   : > { %v276_v47 = vmul.f32 %v431_v40, %v275_v44 }
  0xb8   : > { %v291_v50 = vmul.f32 %v433_v41, %v290_v46 }
  0xb9   : > { %v277_v54 = vadd.f32 %v431_v40, %v276_v47 }
  0xba   : > { %v292_v58 = vadd.f32 %v433_v41, %v291_v50 }
  0xbb   : > { %v281_v61 = vsel %vm280_vm8, %v431_v40, %v277_v54 }
  0xbc   : > { %v286_v63 = vsel %vm283_vm10, %v285_v57, %v281_v61  ;;  %v296_v0 = vsel %vm295_vm11, %v433_v41, %v292_v58 }
  0xbd   : > { %v301_v1 = vsel %vm298_vm12, %v300_v62, %v296_v0  ;;  %v309_v2 = vmul.f32 %v303_v52, %v286_v63  ;;  %v311_v3 = vmul.f32 %v305_v55, %v286_v63  ;;  %v313_v4 = vmul.f32 %v307_v56, %v286_v63 }
  0xbe   : > { %v310_v5 = vmul.f32 %v304_v53, %v301_v1  ;;  %v312_v6 = vmul.f32 %v306_v59, %v301_v1  ;;  %v314_v7 = vmul.f32 %v308_v60, %v301_v1 }
  0xbf   : > { %v315_v8 = vsub.f32 %v303_v52, %v309_v2  ;;  %v317_v9 = vsub.f32 %v305_v55, %v311_v3  ;;  %v319_v12 = vsub.f32 %v307_v56, %v313_v4 }
  0xc0   : > { %v316_v10 = vsub.f32 %v304_v53, %v310_v5  ;;  %v318_v11 = vsub.f32 %v306_v59, %v312_v6  ;;  %v320_v13 = vsub.f32 %v308_v60, %v314_v7 }
  0xc1   : > { %322 = vst.msk [vmem:[%s221_s29] sm:$0xff] %vm321_vm13, %v315_v8 }
  0xc2   : > { %323 = vst.msk [vmem:[%s221_s29 + $0x8] sm:$0xff] %vm321_vm13, %v316_v10 }
  0xc3   : > { %324 = vst.msk [vmem:[%s221_s29 + $0x10] sm:$0xff] %vm321_vm13, %v317_v9 }
  0xc4   : > { %325 = vst.msk [vmem:[%s221_s29 + $0x18] sm:$0xff] %vm321_vm13, %v318_v11 }
  0xc5   : > { %326 = vst.msk [vmem:[%s221_s29 + $0x20] sm:$0xff] %vm321_vm13, %v319_v12 }
  0xc6   : > { %327 = vst.msk [vmem:[%s221_s29 + $0x28] sm:$0xff] %vm321_vm13, %v320_v13 }
  0xc7 PF: > { %s18_s19 = sadd.s32 1, %s440_s19  }
  0xc8   : > { %p15_p4 = scmp.ge.s32.totalorder %s18_s19, 4  }
  0xca   :  { %17 = sbr.rel (!%p15_p4) target bundleno = 4 (0x4), region = 69 }

// kernel: gain_forward.6
= control target key start
LH: loop header
LB: loop body
LE: loop exit
PB: predicated region body
PF: predicated region fallthrough
CT: control target
= control target key end

     0   :  { %s350_s12 = smov 0   ;;  %s422_s0 = inlined_call_operand.vmem [shape: f32[2,1,128], index: 0, kind: input, shape index: {}]   ;;  %s423_s1 = inlined_call_operand.vmem [shape: f32[128,128], index: 1, kind: input, shape index: {}]   ;;  %s424_s2 = inlined_call_operand.vmem [shape: f32[2,16,128], index: 2, kind: input, shape index: {}]   ;;  %s425_s3 = inlined_call_operand.vmem [shape: f32[2,16,1], index: 3, kind: output, shape index: {}]  }
   0x1 LB: > { %s301_s13 = sadd.s32 4294967295, %s328_s12   ;;  %p305_p0 = scmp.ge.s32.totalorder %s328_s12, 1  ;;  %s328_s12 = sphi %s350_s12, %s13_s12  }
   0x2   : > { %p145_p1 = scmp.lt.s32.totalorder %s328_s12, 3 }
   0x4   : > { %p146_p2 = pnand %p305_p0, %p145_p1 }
   0x5   : > { %p172_p3 = scmp.lt.s32.totalorder (!%p146_p2), %s301_s13, 1 }
   0x6   : > { %149 = sbr.rel (%p146_p2) target bundleno = 334 (0x14e), region = 32 }
   0xb   : > { %v201_v0 = vld [vmem:[%s423_s1 + $0x78] sm:$0xff]  ;;  %v200_v1 = vld [vmem:[%s423_s1 + $0x70] sm:$0xff]  ;;  %v199_v2 = vld [vmem:[%s423_s1 + $0x68] sm:$0xff]  ;;  %s427_s13 = smov (!%p172_p3, %s301_s13), 1  ;;  %vm234_vm0 = vcmask 7168  }
   0xc   : > { %202 = vmatpush.xpose.msra.mxu0 %v201_v0  ;;  %v198_v3 = vld [vmem:[%s423_s1 + $0x60] sm:$0xff]  ;;  %v197_v4 = vld [vmem:[%s423_s1 + $0x58] sm:$0xff]  ;;  %v196_v5 = vld [vmem:[%s423_s1 + $0x50] sm:$0xff]  ;;  %s174_s23 = scalar_lea.vmem %s422_s0, %s427_s13  ;;  %s312_s24 = sshll.u32 %s427_s13, 4 }
   0xd   : > { %v195_v6 = vld [vmem:[%s423_s1 + $0x48] sm:$0xff]  ;;  %v194_v7 = vld [vmem:[%s423_s1 + $0x40] sm:$0xff]  ;;  %v193_v8 = vld [vmem:[%s423_s1 + $0x38] sm:$0xff]  ;;  %s179_s27 = scalar_lea.vmem %s424_s2, %s312_s24  ;;  %s184_s30 = scalar_lea.vmem %s425_s3, %s312_s24 }
   0xe   : > { %v192_v9 = vld [vmem:[%s423_s1 + $0x30] sm:$0xff]  ;;  %v191_v10 = vld [vmem:[%s423_s1 + $0x28] sm:$0xff]  ;;  %v190_v11 = vld [vmem:[%s423_s1 + $0x20] sm:$0xff] }
   0xf   : > { %v189_v12 = vld [vmem:[%s423_s1 + $0x18] sm:$0xff]  ;;  %v188_v13 = vld [vmem:[%s423_s1 + $0x10] sm:$0xff]  ;;  %v187_v14 = vld [vmem:[%s423_s1 + $0x8] sm:$0xff] }
  0x10   : > { %203 = vmatpush.xpose.msra.mxu0 %v200_v1  ;;  %v186_v15 = vld [vmem:[%s423_s1] sm:$0xff]  ;;  %v224_v22 = vld [vmem:[%s179_s27 + $0x8] sm:$0xff] }
  0x11   : > { %v185_v16 = vld [vmem:[%s174_s23] sm:$0x1] }
  0x12   : > { %v223_v19 = vld [vmem:[%s179_s27] sm:$0xff] }
  0x14   : > { %204 = vmatpush.xpose.msra.mxu0 %v199_v2 }
  0x18   : > { %205 = vmatpush.xpose.msra.mxu0 %v198_v3 }
  0x1c   : > { %206 = vmatpush.xpose.msra.mxu0 %v197_v4 }
  0x20   : > { %207 = vmatpush.xpose.msra.mxu0 %v196_v5 }
  0x24   : > { %208 = vmatpush.xpose.msra.mxu0 %v195_v6 }
  0x28   : > { %209 = vmatpush.xpose.msra.mxu0 %v194_v7 }
  0x2c   : > { %210 = vmatpush.xpose.msra.mxu0 %v193_v8 }
  0x30   : > { %211 = vmatpush.xpose.msra.mxu0 %v192_v9 }
  0x34   : > { %212 = vmatpush.xpose.msra.mxu0 %v191_v10 }
  0x38   : > { %213 = vmatpush.xpose.msra.mxu0 %v190_v11 }
  0x3c   : > { %214 = vmatpush.xpose.msra.mxu0 %v189_v12 }
  0x40   : > { %215 = vmatpush.xpose.msra.mxu0 %v188_v13 }
  0x44   : > { %216 = vmatpush.xpose.msra.mxu0 %v187_v14 }
  0x48   : > { %217 = vmatpush.xpose.msra.mxu0 %v186_v15 }
  0x4b   : > { %218 = vmatmul.f32.vlgmr.msra.gmra.mxu0 %v185_v16 }
  0xc8   : > { %v219_v17 = vpop.f32.mrf.mxu0 }
  0xc9   : > { %v222_v18 = vmul.f32 0.0625, %v219_v17 }
  0xcb   : > { %v225_v20 = vperm.slane %v222_v18, 0 }
  0xcd   : > { %v226_v21 = vmul.f32 %v225_v20, %v223_v19  ;;  %v227_v23 = vmul.f32 %v225_v20, %v224_v22 }
  0xcf   : > { %228 = vadd.xlane.f32.xlu0 %v226_v21 }
  0xd7   : > { %230 = vadd.xlane.f32.xlu0 %v227_v23 }
 0x142   : > { %v229_v24 = vpop.xlane.xlu0 %228 }
 0x143   : > { %v232_v25 = vmax.f32 %v229_v24, 0.0 }
 0x145   : > { %235 = vst.msk [vmem:[%s184_s30] sm:$0xff] %vm234_vm0, %v232_v25 }
 0x14a   : > { %v231_v26 = vpop.xlane.xlu0 %230 }
 0x14b   : > { %v233_v27 = vmax.f32 %v231_v26, 0.0 }
 0x14d   : > { %236 = vst.msk [vmem:[%s184_s30 + $0x8] sm:$0xff] %vm234_vm0, %v233_v27 }
 0x14e PF: > { %s13_s12 = sadd.s32 1, %s328_s12  }
 0x14f   : > { %p10_p4 = scmp.ge.s32.totalorder %s13_s12, 4  }
 0x151   :  { %12 = sbr.rel (!%p10_p4) target bundleno = 1 (0x1), region = 65 }

// kernel: gain_forward.5
= control target key start
LH: loop header
LB: loop body
LE: loop exit
PB: predicated region body
PF: predicated region fallthrough
CT: control target
= control target key end

     0   :  { %12 = vsyncpa [#allocation4], 0  ;;  %s951_s0 = inlined_call_operand.vmem [shape: f32[2,16,128], index: 0, kind: input, shape index: {}]   ;;  %s952_s1 = inlined_call_operand.vmem [shape: f32[128,128], index: 1, kind: input, shape index: {}]   ;;  %s953_s2 = inlined_call_operand.vmem [shape: f32[1,128], index: 2, kind: input, shape index: {}]   ;;  %s954_s3 = inlined_call_operand.vmem [shape: f32[128,128], index: 3, kind: input, shape index: {}]   ;;  %s955_s4 = inlined_call_operand.vmem [shape: f32[1,128], index: 4, kind: input, shape index: {}]   ;;  %s956_s5 = inlined_call_operand.vmem [shape: f32[2,16,128], index: 5, kind: output, shape index: {0}]   ;;  %s957_s6 = inlined_call_operand.hbm [shape: f32[2,1,128], index: 6, kind: output, shape index: {1}]  }
   0x1   :  { %14 = vsyncpa [#allocation4 + $0x1], 0  ;;  %s742_s21 = smov 0   ;;  %s744_s22 = smov 0  }
   0x2   :  { %s746_s23 = smov 0   ;;  %s748_s24 = smov 0  }
   0x3   :  { %s750_s25 = smov 0   ;;  %s752_s26 = smov 0  }
   0x4 LB: > { %s540_s27 = sadd.s32 4294967295, %s704_s26   ;;  %s541_s28 = sadd.s32 4294967294, %s704_s26   ;;  %s704_s26 = sphi %s752_s26, %s20_s26   ;;  %s700_s25 = sphi %s750_s25, %s964_s25   ;;  %s696_s24 = sphi %s748_s24, %s963_s24   ;;  %s692_s23 = sphi %s746_s23, %s962_s23   ;;  %s688_s22 = sphi %s744_s22, %s961_s22   ;;  %s684_s21 = sphi %s742_s21, %s960_s21  }
   0x5   : > { %s32_s29 = sadd.s32 1, %s700_s25  ;;  %s179_s30 = sadd.s32 1, %s692_s23 }
   0x6   : > { %p34_p0 = scmp.ge.s32.totalorder %s32_s29, 2  ;;  %p189_p1 = scmp.ne.s32.totalorder %s692_s23, %s688_s22 }
   0x7   : > { %p190_p2 = scmp.eq.s32.totalorder %s540_s27, 1  ;;  %p195_p3 = scmp.ne.s32.totalorder %s688_s22, %s684_s21 }
   0x8   : > { %s966_s29 = smov (%p34_p0, %s32_s29), 0  ;;  %p196_p5 = scmp.eq.s32.totalorder %s541_s28, 1 }
   0x9   : > { %p782_p4 = por %p190_p2, %p189_p1  ;;  %s176_s8 = ssub.s32 %s700_s25, %s966_s29 }
   0xa   : > { %p544_p6 = scmp.ge.s32.totalorder %s704_s26, 1  ;;  %p177_p7 = scmp.eq.s32.totalorder %s176_s8, 0 }
   0xb   : > { %p789_p8 = por %p196_p5, %p195_p3  ;;  %p239_p9 = scmp.lt.s32.totalorder %s704_s26, 3 }
   0xc   : > { %s795_s10 = scalar_select %p177_p7, %s692_s23, %s179_s30  }
   0xd   : > { %p240_p10 = pnand %p544_p6, %p239_p9 }
   0xe   : > { %p282_p11 = scmp.lt.s32.totalorder (!%p240_p10), %s696_s24, 1  ;;  %s430_s30 = scalar_lea.hbm (!%p240_p10), %s957_s6, %s696_s24 }
   0xf   : > { %243 = sbr.rel (%p240_p10) target bundleno = 345 (0x159), region = 40  ;;  %s434_s15 = sshll.u32 (!%p240_p10), %s430_s30, 4  ;;  %s435_s15 = int_to_ptr.hbm [resolvable:$true] %s434_s15 }
  0x14   : > { %v318_v0 = vld [vmem:[%s952_s1 + $0x78] sm:$0xff]  ;;  %v317_v1 = vld [vmem:[%s952_s1 + $0x70] sm:$0xff]  ;;  %v316_v2 = vld [vmem:[%s952_s1 + $0x68] sm:$0xff]  ;;  %s832_s19 = scalar_select %p282_p11, %s696_s24, 1  ;;  %v706_v22 = vmov 0.0  }
  0x15   : > { %553 = vmatpush.msra.mxu2 %v318_v0  ;;  %323 = vmatpush.msra.mxu0 %v318_v0  ;;  %v315_v3 = vld [vmem:[%s952_s1 + $0x60] sm:$0xff]  ;;  %v314_v4 = vld [vmem:[%s952_s1 + $0x58] sm:$0xff]  ;;  %v313_v5 = vld [vmem:[%s952_s1 + $0x50] sm:$0xff]  ;;  %354 = vst [vmem:[#allocation2] sm:$0x1] %v706_v22 }
  0x16   : > { %v312_v6 = vld [vmem:[%s952_s1 + $0x48] sm:$0xff]  ;;  %v311_v7 = vld [vmem:[%s952_s1 + $0x40] sm:$0xff]  ;;  %v310_v8 = vld [vmem:[%s952_s1 + $0x38] sm:$0xff]  ;;  %s551_s8 = sshll.u32 %s832_s19, 4  ;;  %s279_s19 = sand.u32 1, %s688_s22  }
  0x17   : > { %554 = vmatpush.msra.mxu2 %v317_v1  ;;  %324 = vmatpush.msra.mxu0 %v317_v1  ;;  %v309_v9 = vld [vmem:[%s952_s1 + $0x30] sm:$0xff]  ;;  %v308_v10 = vld [vmem:[%s952_s1 + $0x28] sm:$0xff]  ;;  %v307_v11 = vld [vmem:[%s952_s1 + $0x20] sm:$0xff]  ;;  %s289_s17 = scalar_lea.vmem %s951_s0, %s551_s8  ;;  %s299_s27 = scalar_lea.vmem %s956_s5, %s551_s8 }
  0x18   : > { %v306_v12 = vld [vmem:[%s952_s1 + $0x18] sm:$0xff]  ;;  %v305_v13 = vld [vmem:[%s952_s1 + $0x10] sm:$0xff]  ;;  %v304_v14 = vld [vmem:[%s952_s1 + $0x8] sm:$0xff]  ;;  %s280_s13 = scalar_lea.vmem [#allocation3], %s279_s19  ;;  %s418_s16 = scalar_lea.sflag [#allocation4], %s279_s19 }
  0x19   : > { %555 = vmatpush.msra.mxu2 %v316_v2  ;;  %325 = vmatpush.msra.mxu0 %v316_v2  ;;  %v303_v15 = vld [vmem:[%s952_s1] sm:$0xff]  ;;  %v302_v16 = vld [vmem:[%s289_s17 + $0x8] sm:$0xff]  ;;  %v385_v18 = vld [vmem:[%s954_s3 + $0x78] sm:$0xff]  ;;  %s432_s14 = sshll.u32 %s280_s13, 4  ;;  %s433_s14 = int_to_ptr.vmem [resolvable:$true] %s432_s14 }
  0x1a   : > { %v301_v17 = vld [vmem:[%s289_s17] sm:$0xff]  ;;  %387 = vmatpush.msra.mxu1 %v385_v18  ;;  %v384_v19 = vld [vmem:[%s954_s3 + $0x70] sm:$0xff]  ;;  %v383_v20 = vld [vmem:[%s954_s3 + $0x68] sm:$0xff]  ;;  %s640_s17 = sshra.s32 %s435_s15, 4  ;;  %s641_s17 = int_to_ptr.hbm [resolvable:$true] %s640_s17 }
  0x1b   : > { %556 = vmatpush.msra.mxu2 %v315_v3  ;;  %326 = vmatpush.msra.mxu0 %v315_v3  ;;  %v382_v21 = vld [vmem:[%s954_s3 + $0x60] sm:$0xff]  ;;  %v381_v23 = vld [vmem:[%s954_s3 + $0x58] sm:$0xff]  ;;  %v380_v24 = vld [vmem:[%s954_s3 + $0x50] sm:$0xff]  ;;  %s642_s18 = scalar_lea.hbm %s641_s17, 1  ;;  %p647_p1 = scmp.lt.s32.totalorder %s641_s17, %s957_s6 }
  0x1c   : > { %388 = vmatpush.msra.mxu1 %v384_v19  ;;  %v379_v25 = vld [vmem:[%s954_s3 + $0x48] sm:$0xff]  ;;  %v378_v26 = vld [vmem:[%s954_s3 + $0x40] sm:$0xff]  ;;  %v377_v27 = vld [vmem:[%s954_s3 + $0x38] sm:$0xff]  ;;  %p643_p12 = scmp.ne.s32.totalorder %s641_s17, %s642_s18 }
  0x1d   : > { %557 = vmatpush.msra.mxu2 %v314_v4  ;;  %327 = vmatpush.msra.mxu0 %v314_v4  ;;  %v376_v28 = vld [vmem:[%s954_s3 + $0x30] sm:$0xff]  ;;  %v375_v29 = vld [vmem:[%s954_s3 + $0x28] sm:$0xff]  ;;  %v374_v30 = vld [vmem:[%s954_s3 + $0x20] sm:$0xff] }
  0x1e   : > { %389 = vmatpush.msra.mxu1 %v383_v20  ;;  %v625_v31 = vld [vmem:[%s953_s2] ss:$0 sm:$0xff]  ;;  %v373_v32 = vld [vmem:[%s954_s3 + $0x18] sm:$0xff]  ;;  %v372_v33 = vld [vmem:[%s954_s3 + $0x10] sm:$0xff]  ;;  %p644_p13 = pnand %p643_p12, %p782_p4 }
  0x1f   : > { %558 = vmatpush.msra.mxu2 %v313_v5  ;;  %328 = vmatpush.msra.mxu0 %v313_v5  ;;  %v371_v34 = vld [vmem:[%s954_s3 + $0x8] sm:$0xff]  ;;  %v370_v37 = vld [vmem:[%s954_s3] sm:$0xff] }
  0x20   : > { %390 = vmatpush.msra.mxu1 %v382_v21  ;;  %v355_v49 = vld [vmem:[#allocation2] sm:$0x1]  ;;  %p645_p0 = pneg %p644_p13 }
  0x21   : > { %559 = vmatpush.msra.mxu2 %v312_v6  ;;  %329 = vmatpush.msra.mxu0 %v312_v6  ;;  %v386_v53 = vld [vmem:[%s955_s4] sm:$0x1] }
  0x22   : > { %391 = vmatpush.msra.mxu1 %v381_v23 }
  0x23   : > { %560 = vmatpush.msra.mxu2 %v311_v7  ;;  %330 = vmatpush.msra.mxu0 %v311_v7 }
  0x24   : > { %392 = vmatpush.msra.mxu1 %v380_v24 }
  0x25   : > { %561 = vmatpush.msra.mxu2 %v310_v8  ;;  %331 = vmatpush.msra.mxu0 %v310_v8 }
  0x26   : > { %393 = vmatpush.msra.mxu1 %v379_v25 }
  0x27   : > { %562 = vmatpush.msra.mxu2 %v309_v9  ;;  %332 = vmatpush.msra.mxu0 %v309_v9 }
  0x28   : > { %394 = vmatpush.msra.mxu1 %v378_v26 }
  0x29   : > { %563 = vmatpush.msra.mxu2 %v308_v10  ;;  %333 = vmatpush.msra.mxu0 %v308_v10 }
  0x2a   : > { %395 = vmatpush.msra.mxu1 %v377_v27 }
  0x2b   : > { %564 = vmatpush.msra.mxu2 %v307_v11  ;;  %334 = vmatpush.msra.mxu0 %v307_v11 }
  0x2c   : > { %396 = vmatpush.msra.mxu1 %v376_v28 }
  0x2d   : > { %565 = vmatpush.msra.mxu2 %v306_v12  ;;  %335 = vmatpush.msra.mxu0 %v306_v12 }
  0x2e   : > { %397 = vmatpush.msra.mxu1 %v375_v29 }
  0x2f   : > { %566 = vmatpush.msra.mxu2 %v305_v13  ;;  %336 = vmatpush.msra.mxu0 %v305_v13 }
  0x30   : > { %398 = vmatpush.msra.mxu1 %v374_v30 }
  0x31   : > { %567 = vmatpush.msra.mxu2 %v304_v14  ;;  %337 = vmatpush.msra.mxu0 %v304_v14 }
  0x32   : > { %399 = vmatpush.msra.mxu1 %v373_v32 }
  0x33   : > { %568 = vmatpush.msra.mxu2 %v303_v15  ;;  %338 = vmatpush.msra.mxu0 %v303_v15 }
  0x34   : > { %342 = vmatmul.f32.vlgmr.msra.gmra.mxu2 %v302_v16  ;;  %339 = vmatmul.f32.vlgmr.msra.gmra.mxu0 %v301_v17 }
  0x35   : > { %400 = vmatpush.msra.mxu1 %v372_v33 }
  0x37   : > { %401 = vmatpush.msra.mxu1 %v371_v34 }
  0x39   : > { %402 = vmatpush.msra.mxu1 %v370_v37 }
  0xb1   : > { %v340_v35 = vpop.f32.mrf.mxu0 }
  0xb2   : > { %v341_v36 = vadd.f32 %v625_v31, %v340_v35 }
  0xb4   : > { %v346_v38 = vmax.f32 %v341_v36, 0.0 }
  0xb6   : > { %348 = vst [vmem:[%s299_s27] sm:$0xff] %v346_v38 }
  0xb7   : > { %v343_v39 = vpop.f32.mrf.mxu2 }
  0xb8   : > { %v344_v40 = vadd.f32 %v625_v31, %v343_v39 }
  0xba   : > { %v347_v41 = vmax.f32 %v344_v40, 0.0 }
  0xbc   : > { %349 = vst [vmem:[%s299_s27 + $0x8] sm:$0xff] %v347_v41  ;;  %v356_v42 = vadd.f32 %v347_v41, %v346_v38  ;;  %s646_s27 = scalar_lea.hbm %s957_s6, 2 }
  0xbd   : > { %p648_p2 = scmp.lt.s32.totalorder %s646_s27, %s642_s18 }
  0xbe   : > { %v357_v43 = vrot.slane %v356_v42, 4 }
  0xbf   : > { %p649_p3 = por %p648_p2, %p647_p1 }
  0xc0   : > { %v358_v44 = vadd.f32 %v357_v43, %v356_v42 }
  0xc1   : > { %p650_p5 = pnand %p649_p3, %p645_p0 }
  0xc2   : > { %v359_v45 = vrot.slane %v358_v44, 2 }
  0xc4   : > { %v360_v46 = vadd.f32 %v359_v45, %v358_v44 }
  0xc6   : > { %v361_v47 = vrot.slane %v360_v46, 1 }
  0xc8   : > { %v362_v48 = vadd.f32 %v361_v47, %v360_v46 }
  0xca   : > { %v363_v50 = vmul.f32 0.0625, %v362_v48 }
  0xcc   : > { %v364_v51 = vadd.f32 %v363_v50, %v355_v49 }
  0xce   : > { %365 = vst [vmem:[#allocation2] sm:$0x1] %v364_v51 }
  0xd5   : > { %v369_v52 = vld [vmem:[#allocation2] sm:$0x1] }
  0xd6   : > { %403 = vmatmul.f32.vlgmr.msra.gmra.mxu1 %v369_v52 }
 0x153   : > { %v404_v54 = vpop.f32.mrf.mxu1 }
 0x154   : > { %v405_v55 = vadd.f32 %v404_v54, %v386_v53 }
 0x156   : > { %407 = vst [vmem:[%s280_s13] sm:$0x1] %v405_v55 }
 0x157   : > { %653 = shalt.err (!%p650_p5)
}
 0x158   : > { %569 = dma.vmem_to_hbm [thread:$0]  (%p782_p4), %s433_s14, 16, %s435_s15, %s418_s16  }
 0x159 PF: > { %p575_p6 = scmp.ge.s32.totalorder %s704_s26, 2  ;;  %s458_s19 = sand.u32 1, %s684_s21  }
 0x15a   : > { %s459_s30 = scalar_lea.sflag [#allocation4], %s458_s19 }
 0x15b   : > { %p572_p7 = pnand %p575_p6, %p789_p8 }
 0x15d   : > { %p573_p9 = pneg %p572_p7 }
 0x15f   : > { %679 = dma.done.wait (%p573_p9), %s459_s30, 16  }
 0x160   : > { %681 = vsyncadd (%p573_p9), %s459_s30, 4294967280  ;;  %s20_s26 = sadd.s32 1, %s704_s26   ;;  %s960_s21 = smov %s688_s22 }
 0x161   : > { %p17_p10 = scmp.ge.s32.totalorder %s20_s26, 4   ;;  %s961_s22 = smov %s692_s23 }
 0x162   : > { %s962_s23 = smov %s795_s10  ;;  %s963_s24 = smov %s700_s25 }
 0x163   : > { %s964_s25 = smov %s966_s29  ;;  %19 = sbr.rel (!%p17_p10) target bundleno = 4 (0x4), region = 95 }
 0x168   :  { %464 = vsyncpa [#allocation4], 1 }
 0x169   :  { %466 = vsyncpa [#allocation4 + $0x1], 1 }

// kernel: gain_forward.9
= control target key start
LH: loop header
LB: loop body
LE: loop exit
PB: predicated region body
PF: predicated region fallthrough
CT: control target
= control target key end

     0   :  { %10 = vsyncpa [#allocation4], 0  ;;  %s830_s0 = inlined_call_operand.vmem [shape: f32[2,16,128], index: 0, kind: input, shape index: {}]   ;;  %s831_s1 = inlined_call_operand.vmem [shape: f32[128,128], index: 1, kind: input, shape index: {}]   ;;  %s832_s2 = inlined_call_operand.vmem [shape: f32[1,128], index: 2, kind: input, shape index: {}]   ;;  %s833_s3 = inlined_call_operand.vmem [shape: f32[128,128], index: 3, kind: input, shape index: {}]   ;;  %s834_s4 = inlined_call_operand.vmem [shape: f32[1,128], index: 4, kind: input, shape index: {}]   ;;  %s835_s5 = inlined_call_operand.hbm [shape: f32[2,1,128], index: 5, kind: output, shape index: {}]  }
   0x1   :  { %12 = vsyncpa [#allocation4 + $0x1], 0  ;;  %s631_s18 = smov 0   ;;  %s633_s19 = smov 0  }
   0x2   :  { %s635_s20 = smov 0   ;;  %s637_s21 = smov 0  }
   0x3   :  { %s639_s22 = smov 0   ;;  %s641_s23 = smov 0  }
   0x4 LB: > { %s437_s24 = sadd.s32 4294967295, %s598_s23   ;;  %s438_s25 = sadd.s32 4294967294, %s598_s23   ;;  %s598_s23 = sphi %s641_s23, %s18_s23   ;;  %s594_s22 = sphi %s639_s22, %s842_s22   ;;  %s590_s21 = sphi %s637_s21, %s841_s21   ;;  %s586_s20 = sphi %s635_s20, %s840_s20   ;;  %s582_s19 = sphi %s633_s19, %s839_s19   ;;  %s578_s18 = sphi %s631_s18, %s838_s18  }
   0x5   : > { %s30_s26 = sadd.s32 1, %s594_s22  ;;  %s149_s27 = sadd.s32 1, %s586_s20 }
   0x6   : > { %p32_p0 = scmp.ge.s32.totalorder %s30_s26, 2  ;;  %p159_p1 = scmp.ne.s32.totalorder %s586_s20, %s582_s19 }
   0x7   : > { %p160_p2 = scmp.eq.s32.totalorder %s437_s24, 1  ;;  %p165_p3 = scmp.ne.s32.totalorder %s582_s19, %s578_s18 }
   0x8   : > { %s844_s26 = smov (%p32_p0, %s30_s26), 0  ;;  %p166_p5 = scmp.eq.s32.totalorder %s438_s25, 1 }
   0x9   : > { %p671_p4 = por %p160_p2, %p159_p1  ;;  %s146_s29 = ssub.s32 %s594_s22, %s844_s26 }
   0xa   : > { %p441_p6 = scmp.ge.s32.totalorder %s598_s23, 1  ;;  %p147_p7 = scmp.eq.s32.totalorder %s146_s29, 0 }
   0xb   : > { %p678_p8 = por %p166_p5, %p165_p3  ;;  %p209_p9 = scmp.lt.s32.totalorder %s598_s23, 3 }
   0xc   : > { %s684_s6 = scalar_select %p147_p7, %s586_s20, %s149_s27  }
   0xd   : > { %p210_p10 = pnand %p441_p6, %p209_p9 }
   0xe   : > { %p241_p11 = scmp.lt.s32.totalorder (!%p210_p10), %s590_s21, 1  ;;  %s238_s24 = sand.u32 (!%p210_p10), 1, %s582_s19  }
   0xf   : > { %213 = sbr.rel (%p210_p10) target bundleno = 345 (0x159), region = 40  ;;  %s364_s29 = scalar_lea.hbm (!%p210_p10), %s835_s5, %s590_s21 }
  0x10   : > { %s239_s9 = scalar_lea.vmem (!%p210_p10), [#allocation3], %s238_s24  ;;  %s356_s12 = scalar_lea.sflag (!%p210_p10), [#allocation4], %s238_s24 }
  0x11   : > { %s366_s10 = sshll.u32 (!%p210_p10), %s239_s9, 4  ;;  %s540_s16 = scalar_lea.hbm (!%p210_p10), %s835_s5, 2  ;;  %s367_s10 = int_to_ptr.vmem [resolvable:$true] %s366_s10 }
  0x14   : > { %v267_v0 = vld [vmem:[%s831_s1 + $0x78] sm:$0xff]  ;;  %v266_v1 = vld [vmem:[%s831_s1 + $0x70] sm:$0xff]  ;;  %v265_v2 = vld [vmem:[%s831_s1 + $0x68] sm:$0xff]  ;;  %s242_s14 = scalar_select %p241_p11, %s590_s21, 1  ;;  %v600_v21 = vmov 0.0  }
  0x15   : > { %447 = vmatpush.msra.mxu2 %v267_v0  ;;  %272 = vmatpush.msra.mxu0 %v267_v0  ;;  %v264_v3 = vld [vmem:[%s831_s1 + $0x60] sm:$0xff]  ;;  %v263_v4 = vld [vmem:[%s831_s1 + $0x58] sm:$0xff]  ;;  %v262_v5 = vld [vmem:[%s831_s1 + $0x50] sm:$0xff]  ;;  %301 = vst [vmem:[#allocation2] sm:$0x1] %v600_v21 }
  0x16   : > { %v261_v6 = vld [vmem:[%s831_s1 + $0x48] sm:$0xff]  ;;  %v260_v7 = vld [vmem:[%s831_s1 + $0x40] sm:$0xff]  ;;  %v259_v8 = vld [vmem:[%s831_s1 + $0x38] sm:$0xff]  ;;  %s446_s25 = sshll.u32 %s242_s14, 4 }
  0x17   : > { %448 = vmatpush.msra.mxu2 %v266_v1  ;;  %273 = vmatpush.msra.mxu0 %v266_v1  ;;  %v258_v9 = vld [vmem:[%s831_s1 + $0x30] sm:$0xff]  ;;  %v257_v10 = vld [vmem:[%s831_s1 + $0x28] sm:$0xff]  ;;  %v256_v11 = vld [vmem:[%s831_s1 + $0x20] sm:$0xff]  ;;  %s248_s11 = scalar_lea.vmem %s830_s0, %s446_s25 }
  0x18   : > { %v255_v12 = vld [vmem:[%s831_s1 + $0x18] sm:$0xff]  ;;  %v254_v13 = vld [vmem:[%s831_s1 + $0x10] sm:$0xff]  ;;  %v253_v14 = vld [vmem:[%s831_s1 + $0x8] sm:$0xff] }
  0x19   : > { %449 = vmatpush.msra.mxu2 %v265_v2  ;;  %274 = vmatpush.msra.mxu0 %v265_v2  ;;  %v252_v15 = vld [vmem:[%s831_s1] sm:$0xff]  ;;  %v251_v16 = vld [vmem:[%s248_s11 + $0x8] sm:$0xff]  ;;  %v332_v18 = vld [vmem:[%s833_s3 + $0x78] sm:$0xff] }
  0x1a   : > { %v250_v17 = vld [vmem:[%s248_s11] sm:$0xff]  ;;  %334 = vmatpush.msra.mxu1 %v332_v18  ;;  %v331_v19 = vld [vmem:[%s833_s3 + $0x70] sm:$0xff]  ;;  %v330_v20 = vld [vmem:[%s833_s3 + $0x68] sm:$0xff]  ;;  %s368_s11 = sshll.u32 %s364_s29, 4  ;;  %s369_s11 = int_to_ptr.hbm [resolvable:$true] %s368_s11 }
  0x1b   : > { %450 = vmatpush.msra.mxu2 %v264_v3  ;;  %275 = vmatpush.msra.mxu0 %v264_v3  ;;  %v329_v22 = vld [vmem:[%s833_s3 + $0x60] sm:$0xff]  ;;  %v328_v23 = vld [vmem:[%s833_s3 + $0x58] sm:$0xff]  ;;  %v327_v24 = vld [vmem:[%s833_s3 + $0x50] sm:$0xff]  ;;  %s534_s13 = sshra.s32 %s369_s11, 4  ;;  %s535_s13 = int_to_ptr.hbm [resolvable:$true] %s534_s13 }
  0x1c   : > { %335 = vmatpush.msra.mxu1 %v331_v19  ;;  %v326_v25 = vld [vmem:[%s833_s3 + $0x48] sm:$0xff]  ;;  %v325_v26 = vld [vmem:[%s833_s3 + $0x40] sm:$0xff]  ;;  %v324_v27 = vld [vmem:[%s833_s3 + $0x38] sm:$0xff]  ;;  %s536_s14 = scalar_lea.hbm %s535_s13, 1  ;;  %p541_p1 = scmp.lt.s32.totalorder %s535_s13, %s835_s5 }
  0x1d   : > { %451 = vmatpush.msra.mxu2 %v263_v4  ;;  %276 = vmatpush.msra.mxu0 %v263_v4  ;;  %v323_v28 = vld [vmem:[%s833_s3 + $0x30] sm:$0xff]  ;;  %v322_v29 = vld [vmem:[%s833_s3 + $0x28] sm:$0xff]  ;;  %v321_v30 = vld [vmem:[%s833_s3 + $0x20] sm:$0xff]  ;;  %p537_p12 = scmp.ne.s32.totalorder %s535_s13, %s536_s14  ;;  %p542_p2 = scmp.lt.s32.totalorder %s540_s16, %s536_s14 }
  0x1e   : > { %336 = vmatpush.msra.mxu1 %v330_v20  ;;  %v320_v31 = vld [vmem:[%s833_s3 + $0x18] sm:$0xff]  ;;  %v319_v32 = vld [vmem:[%s833_s3 + $0x10] sm:$0xff]  ;;  %v519_v33 = vld [vmem:[%s832_s2] ss:$0 sm:$0xff] }
  0x1f   : > { %452 = vmatpush.msra.mxu2 %v262_v5  ;;  %277 = vmatpush.msra.mxu0 %v262_v5  ;;  %v318_v34 = vld [vmem:[%s833_s3 + $0x8] sm:$0xff]  ;;  %v317_v36 = vld [vmem:[%s833_s3] sm:$0xff]  ;;  %p538_p13 = pnand %p537_p12, %p671_p4  ;;  %p543_p3 = por %p542_p2, %p541_p1 }
  0x20   : > { %337 = vmatpush.msra.mxu1 %v329_v22  ;;  %v302_v49 = vld [vmem:[#allocation2] sm:$0x1] }
  0x21   : > { %453 = vmatpush.msra.mxu2 %v261_v6  ;;  %278 = vmatpush.msra.mxu0 %v261_v6  ;;  %v333_v53 = vld [vmem:[%s834_s4] sm:$0x1]  ;;  %p539_p0 = pneg %p538_p13 }
  0x22   : > { %338 = vmatpush.msra.mxu1 %v328_v23 }
  0x23   : > { %454 = vmatpush.msra.mxu2 %v260_v7  ;;  %279 = vmatpush.msra.mxu0 %v260_v7  ;;  %p544_p5 = pnand %p543_p3, %p539_p0 }
  0x24   : > { %339 = vmatpush.msra.mxu1 %v327_v24 }
  0x25   : > { %455 = vmatpush.msra.mxu2 %v259_v8  ;;  %280 = vmatpush.msra.mxu0 %v259_v8 }
  0x26   : > { %340 = vmatpush.msra.mxu1 %v326_v25 }
  0x27   : > { %456 = vmatpush.msra.mxu2 %v258_v9  ;;  %281 = vmatpush.msra.mxu0 %v258_v9 }
  0x28   : > { %341 = vmatpush.msra.mxu1 %v325_v26 }
  0x29   : > { %457 = vmatpush.msra.mxu2 %v257_v10  ;;  %282 = vmatpush.msra.mxu0 %v257_v10 }
  0x2a   : > { %342 = vmatpush.msra.mxu1 %v324_v27 }
  0x2b   : > { %458 = vmatpush.msra.mxu2 %v256_v11  ;;  %283 = vmatpush.msra.mxu0 %v256_v11 }
  0x2c   : > { %343 = vmatpush.msra.mxu1 %v323_v28 }
  0x2d   : > { %459 = vmatpush.msra.mxu2 %v255_v12  ;;  %284 = vmatpush.msra.mxu0 %v255_v12 }
  0x2e   : > { %344 = vmatpush.msra.mxu1 %v322_v29 }
  0x2f   : > { %460 = vmatpush.msra.mxu2 %v254_v13  ;;  %285 = vmatpush.msra.mxu0 %v254_v13 }
  0x30   : > { %345 = vmatpush.msra.mxu1 %v321_v30 }
  0x31   : > { %461 = vmatpush.msra.mxu2 %v253_v14  ;;  %286 = vmatpush.msra.mxu0 %v253_v14 }
  0x32   : > { %346 = vmatpush.msra.mxu1 %v320_v31 }
  0x33   : > { %462 = vmatpush.msra.mxu2 %v252_v15  ;;  %287 = vmatpush.msra.mxu0 %v252_v15 }
  0x34   : > { %291 = vmatmul.f32.vlgmr.msra.gmra.mxu2 %v251_v16  ;;  %288 = vmatmul.f32.vlgmr.msra.gmra.mxu0 %v250_v17 }
  0x35   : > { %347 = vmatpush.msra.mxu1 %v319_v32 }
  0x37   : > { %348 = vmatpush.msra.mxu1 %v318_v34 }
  0x39   : > { %349 = vmatpush.msra.mxu1 %v317_v36 }
  0xb1   : > { %v289_v35 = vpop.f32.mrf.mxu0 }
  0xb2   : > { %v290_v37 = vadd.f32 %v519_v33, %v289_v35 }
  0xb4   : > { %v295_v39 = vmax.f32 %v290_v37, 0.0 }
  0xb7   : > { %v292_v38 = vpop.f32.mrf.mxu2 }
  0xb8   : > { %v293_v40 = vadd.f32 %v519_v33, %v292_v38 }
  0xba   : > { %v296_v41 = vmax.f32 %v293_v40, 0.0 }
  0xbc   : > { %v303_v42 = vadd.f32 %v296_v41, %v295_v39 }
  0xbe   : > { %v304_v43 = vrot.slane %v303_v42, 4 }
  0xc0   : > { %v305_v44 = vadd.f32 %v304_v43, %v303_v42 }
  0xc2   : > { %v306_v45 = vrot.slane %v305_v44, 2 }
  0xc4   : > { %v307_v46 = vadd.f32 %v306_v45, %v305_v44 }
  0xc6   : > { %v308_v47 = vrot.slane %v307_v46, 1 }
  0xc8   : > { %v309_v48 = vadd.f32 %v308_v47, %v307_v46 }
  0xca   : > { %v310_v50 = vmul.f32 0.0625, %v309_v48 }
  0xcc   : > { %v311_v51 = vadd.f32 %v310_v50, %v302_v49 }
  0xce   : > { %312 = vst [vmem:[#allocation2] sm:$0x1] %v311_v51 }
  0xd5   : > { %v316_v52 = vld [vmem:[#allocation2] sm:$0x1] }
  0xd6   : > { %350 = vmatmul.f32.vlgmr.msra.gmra.mxu1 %v316_v52 }
 0x153   : > { %v351_v54 = vpop.f32.mrf.mxu1 }
 0x154   : > { %v352_v55 = vadd.f32 %v351_v54, %v333_v53 }
 0x156   : > { %354 = vst [vmem:[%s239_s9] sm:$0x1] %v352_v55 }
 0x157   : > { %547 = shalt.err (!%p544_p5)
}
 0x158   : > { %463 = dma.vmem_to_hbm [thread:$0]  (%p671_p4), %s367_s10, 16, %s369_s11, %s356_s12  }
 0x159 PF: > { %p469_p6 = scmp.ge.s32.totalorder %s598_s23, 2  ;;  %s380_s24 = sand.u32 1, %s578_s18  }
 0x15a   : > { %s381_s27 = scalar_lea.sflag [#allocation4], %s380_s24 }
 0x15b   : > { %p466_p7 = pnand %p469_p6, %p678_p8 }
 0x15d   : > { %p467_p9 = pneg %p466_p7 }
 0x15f   : > { %573 = dma.done.wait (%p467_p9), %s381_s27, 16  }
 0x160   : > { %575 = vsyncadd (%p467_p9), %s381_s27, 4294967280  ;;  %s18_s23 = sadd.s32 1, %s598_s23   ;;  %s838_s18 = smov %s582_s19 }
 0x161   : > { %p15_p10 = scmp.ge.s32.totalorder %s18_s23, 4   ;;  %s839_s19 = smov %s586_s20 }
 0x162   : > { %s840_s20 = smov %s684_s6  ;;  %s841_s21 = smov %s594_s22 }
 0x163   : > { %s842_s22 = smov %s844_s26  ;;  %17 = sbr.rel (!%p15_p10) target bundleno = 4 (0x4), region = 83 }
 0x168   :  { %386 = vsyncpa [#allocation4], 1 }
 0x169   :  { %388 = vsyncpa [#allocation4 + $0x1], 1 }

</bundles_post_ra>
